<compile_context>
chip_gen: v5e
topology: v5e:2x2
jax: 0.10.0
libtpu: 0.0.40
codegen_flags: <defaults>
</compile_context>

<pallas_src>
import jax
import jax.numpy as jnp
from jax.experimental import pallas as pl
from jax.experimental.pallas import tpu as pltpu

C, H, W = 64, 59, 59
HW = H * W            # 3481
FLAT = C * HW         # 222784 (row-major per-sample flat size)

# Scoped VMEM budget: 4 buffers (in+out, double-buffered) * ~6.8 MiB block
# ~= 27 MiB; 40 MiB is safe on v5e/v6e (128 MiB physical) and v7x (64 MiB).
VMEM_LIMIT_BYTES = 40 << 20


def _unflatten_copy_kernel(x_ref, o_ref):
    # Straight copy of the current (b_tile, FLAT) tile, VMEM -> VMEM.
    # TODO(synk): fuse the downstream consumer of the NCHW tensor here so the
    # HBM traffic pays for real compute; standalone, a reshape needs no kernel.
    o_ref[...] = x_ref[...]


def _batch_tile(batch: int, itemsize: int) -> int:
    """Batch rows per block: native packed sublane tile for the dtype."""
    # 8 rows for 32-bit, 16 for bf16/fp16, 32 for int8 -> dense packed layout
    # and ~6.8 MiB of traffic per buffer for every dtype.
    pack = 8 * max(1, 4 // itemsize)
    if batch <= pack:
        return batch          # full batch extent (always a legal block dim)
    # Keeping b_tile == pack leaves >= 2 grid steps, so megacore (v7x, 2 TCs)
    # can split the copy across cores.
    return pack


def unflatten_2(x: jax.Array) -> jax.Array:
    """Pallas implementation of UnFlatten_2.forward.

    Args:
      x: array with x.shape[0] == B and B * 64 * 59 * 59 total elements
         (e.g. shape (B, 222784), matching the PyTorch flat input).

    Returns:
      Array of shape (B, 64, 59, 59), same dtype, same row-major data order
      as torch's input.view(B, 64, 59, 59).
    """
    B = x.shape[0]
    assert x.size == B * FLAT, (x.shape, FLAT)
    # Flat, row-major view of the per-sample data (metadata-only reshape).
    x2 = x.reshape(B, FLAT)
    itemsize = jnp.dtype(x2.dtype).itemsize

    b_tile = _batch_tile(B, itemsize)
    grid = (pl.cdiv(B, b_tile),)

    out2 = pl.pallas_call(
        _unflatten_copy_kernel,
        out_shape=jax.ShapeDtypeStruct((B, FLAT), x2.dtype),
        grid=grid,
        in_specs=[pl.BlockSpec((b_tile, FLAT), lambda b: (b, 0))],
        out_specs=pl.BlockSpec((b_tile, FLAT), lambda b: (b, 0)),
        compiler_params=pltpu.CompilerParams(
            dimension_semantics=("parallel",),
            vmem_limit_bytes=VMEM_LIMIT_BYTES,
        ),
        cost_estimate=pl.CostEstimate(
            flops=0,
            transcendentals=0,
            bytes_accessed=2 * B * FLAT * itemsize,
        ),
    )(x2)

    # Final reshape to NCHW is pure metadata (row-major), matching torch .view.
    return out2.reshape(B, C, H, W)


def unflatten_2_zero_copy(x: jax.Array) -> jax.Array:
    """The actually-optimal path: metadata-only reshape, zero HBM traffic."""
    return x.reshape(x.shape[0], C, H, W)


if __name__ == "__main__":
    key = jax.random.PRNGKey(0)
    B = 2
    # Input consistent with the module: flat (B, 64*59*59).
    x = jax.random.normal(key, (B, FLAT), dtype=jnp.float32)

    out = unflatten_2(x)
    out = jax.block_until_ready(out)

    # Reference: plain reshape (what torch .view does).
    ref = x.reshape(B, C, H, W)

    assert out.shape == (B, C, H, W), out.shape
    assert out.dtype == x.dtype
    assert bool(jnp.array_equal(out, ref)), "mismatch vs reference reshape"

    # Zero-copy path agrees too (sanity only; it is the recommended prod path).
    assert bool(jnp.array_equal(unflatten_2_zero_copy(x), ref))

    print("KERNEL_OK")
</pallas_src>

<mosaic_0001>
module attributes {stable_mosaic.version = 11 : i64} {
  func.func @_unflatten_copy_kernel(%arg0: i32, %arg1: memref<2x222784xf32, #tpu.memory_space<vmem>>, %arg2: memref<2x222784xf32, #tpu.memory_space<vmem>>) attributes {dimension_semantics = [#tpu.dimension_semantics<parallel>], iteration_bounds = array<i64: 1>, scalar_prefetch = 0 : i64, scratch_operands = 0 : i64, tpu.core_type = #tpu.core_type<tc>, window_params = [{transform_indices = @transform_0, window_bounds = array<i64: 2, 222784>}, {transform_indices = @transform_1, window_bounds = array<i64: 2, 222784>}]} {
    %c0 = arith.constant 0 : index
    %c0_0 = arith.constant 0 : index
    %0 = vector.load %arg1[%c0, %c0_0] : memref<2x222784xf32, #tpu.memory_space<vmem>>, vector<2x222784xf32>
    %c0_1 = arith.constant 0 : index
    %c0_2 = arith.constant 0 : index
    %1 = vector.load %arg2[%c0_1, %c0_2] : memref<2x222784xf32, #tpu.memory_space<vmem>>, vector<2x222784xf32>
    tpu.vector_store %arg2[%c0_1, %c0_2], %0 {strides = array<i32>} : memref<2x222784xf32, #tpu.memory_space<vmem>>, vector<2x222784xf32>,
    return
  }
  func.func @transform_0(%arg0: i32) -> (i32, i32) {
    %c0_i32 = arith.constant 0 : i32
    %c0_i32_0 = arith.constant 0 : i32
    return %arg0, %c0_i32 : i32, i32
  }
  func.func @transform_1(%arg0: i32) -> (i32, i32) {
    %c0_i32 = arith.constant 0 : i32
    %c0_i32_0 = arith.constant 0 : i32
    return %arg0, %c0_i32 : i32, i32
  }
}

</mosaic_0001>

<bundles_post_ra>
// kernel: tpu_custom_call.1
= control target key start
LH: loop header
LB: loop body
LE: loop exit
PB: predicated region body
PF: predicated region fallthrough
CT: control target
= control target key end

     0   :  { %6 = vsyncpa [#allocation3], 0  ;;  %s985_s0 = inlined_call_operand.hbm [shape: f32[2,222784], index: 0, kind: input, shape index: {}]   ;;  %s986_s1 = inlined_call_operand.hbm [shape: f32[2,222784], index: 1, kind: output, shape index: {}]  }
   0x1   :  { %7 = vsyncpa [#allocation4], 0  ;;  %s13_s8 = sshll.u32 %s985_s0, 4  ;;  %s967_s9 = smov [#allocation2]   ;;  %s14_s8 = int_to_ptr.hbm [resolvable:$true] %s13_s8 }
   0x2   :  { %s15_s10 = sshll.u32 %s967_s9, 4  ;;  %s16_s10 = int_to_ptr.vmem [resolvable:$true] %s15_s10 }
   0x3   :  { %18 = dma.hbm_to_vmem [thread:$0]  %s14_s8, 55712, %s16_s10, [#allocation3]  }
   0x4   :  { %963 = dma.done.wait [#allocation3], 55712  }
   0x5   :  { %964 = vsyncadd [#allocation3], 4294911584  ;;  %v23_v0 = vld [vmem:[#allocation2] sm:$0xff]  ;;  %v24_v1 = vld [vmem:[#allocation2 + $0x8] sm:$0xff]  ;;  %s968_s0 = smov [#allocation5]   ;;  %s903_s14 = sshll.u32 %s986_s1, 4  ;;  %s904_s14 = int_to_ptr.hbm [resolvable:$true] %s903_s14 }
   0x6   :  { %v25_v2 = vld [vmem:[#allocation2 + $0x10] sm:$0xff]  ;;  %459 = vst [vmem:[#allocation5] sm:$0xff] %v23_v0  ;;  %v26_v3 = vld [vmem:[#allocation2 + $0x18] sm:$0xff]  ;;  %v27_v4 = vld [vmem:[#allocation2 + $0x20] sm:$0xff]  ;;  %s901_s11 = sshll.u32 %s968_s0, 4  ;;  %vm894_vm0 = vcmask 517120   ;;  %s902_s11 = int_to_ptr.vmem [resolvable:$true] %s901_s11 }
   0x7   :  { %460 = vst [vmem:[#allocation5 + $0x8] sm:$0xff] %v24_v1  ;;  %v28_v5 = vld [vmem:[#allocation2 + $0x28] sm:$0xff]  ;;  %v29_v6 = vld [vmem:[#allocation2 + $0x30] sm:$0xff]  ;;  %v30_v7 = vld [vmem:[#allocation2 + $0x38] sm:$0xff] }
   0x8   :  { %461 = vst [vmem:[#allocation5 + $0x10] sm:$0xff] %v25_v2  ;;  %v31_v8 = vld [vmem:[#allocation2 + $0x40] sm:$0xff]  ;;  %v32_v9 = vld [vmem:[#allocation2 + $0x48] sm:$0xff]  ;;  %v33_v10 = vld [vmem:[#allocation2 + $0x50] sm:$0xff] }
   0x9   :  { %462 = vst [vmem:[#allocation5 + $0x18] sm:$0xff] %v26_v3  ;;  %v34_v11 = vld [vmem:[#allocation2 + $0x58] sm:$0xff]  ;;  %v35_v12 = vld [vmem:[#allocation2 + $0x60] sm:$0xff]  ;;  %v36_v13 = vld [vmem:[#allocation2 + $0x68] sm:$0xff] }
   0xa   :  { %463 = vst [vmem:[#allocation5 + $0x20] sm:$0xff] %v27_v4  ;;  %v37_v14 = vld [vmem:[#allocation2 + $0x70] sm:$0xff]  ;;  %v38_v15 = vld [vmem:[#allocation2 + $0x78] sm:$0xff]  ;;  %v39_v16 = vld [vmem:[#allocation2 + $0x80] sm:$0xff] }
   0xb   :  { %464 = vst [vmem:[#allocation5 + $0x28] sm:$0xff] %v28_v5  ;;  %v40_v17 = vld [vmem:[#allocation2 + $0x88] sm:$0xff]  ;;  %v41_v18 = vld [vmem:[#allocation2 + $0x90] sm:$0xff]  ;;  %v42_v19 = vld [vmem:[#allocation2 + $0x98] sm:$0xff] }
   0xc   :  { %465 = vst [vmem:[#allocation5 + $0x30] sm:$0xff] %v29_v6  ;;  %v43_v20 = vld [vmem:[#allocation2 + $0xa0] sm:$0xff]  ;;  %v44_v21 = vld [vmem:[#allocation2 + $0xa8] sm:$0xff]  ;;  %v45_v22 = vld [vmem:[#allocation2 + $0xb0] sm:$0xff] }
   0xd   :  { %466 = vst [vmem:[#allocation5 + $0x38] sm:$0xff] %v30_v7  ;;  %v46_v23 = vld [vmem:[#allocation2 + $0xb8] sm:$0xff]  ;;  %v47_v24 = vld [vmem:[#allocation2 + $0xc0] sm:$0xff]  ;;  %v48_v25 = vld [vmem:[#allocation2 + $0xc8] sm:$0xff] }
   0xe   :  { %467 = vst [vmem:[#allocation5 + $0x40] sm:$0xff] %v31_v8  ;;  %v49_v26 = vld [vmem:[#allocation2 + $0xd0] sm:$0xff]  ;;  %v50_v27 = vld [vmem:[#allocation2 + $0xd8] sm:$0xff]  ;;  %v51_v28 = vld [vmem:[#allocation2 + $0xe0] sm:$0xff] }
   0xf   :  { %468 = vst [vmem:[#allocation5 + $0x48] sm:$0xff] %v32_v9  ;;  %v52_v29 = vld [vmem:[#allocation2 + $0xe8] sm:$0xff]  ;;  %v53_v30 = vld [vmem:[#allocation2 + $0xf0] sm:$0xff]  ;;  %v54_v31 = vld [vmem:[#allocation2 + $0xf8] sm:$0xff] }
  0x10   :  { %469 = vst [vmem:[#allocation5 + $0x50] sm:$0xff] %v33_v10  ;;  %v55_v32 = vld [vmem:[#allocation2 + $0x100] sm:$0xff]  ;;  %v56_v33 = vld [vmem:[#allocation2 + $0x108] sm:$0xff]  ;;  %v57_v34 = vld [vmem:[#allocation2 + $0x110] sm:$0xff] }
  0x11   :  { %470 = vst [vmem:[#allocation5 + $0x58] sm:$0xff] %v34_v11  ;;  %v58_v35 = vld [vmem:[#allocation2 + $0x118] sm:$0xff]  ;;  %v59_v36 = vld [vmem:[#allocation2 + $0x120] sm:$0xff]  ;;  %v60_v37 = vld [vmem:[#allocation2 + $0x128] sm:$0xff] }
  0x12   :  { %471 = vst [vmem:[#allocation5 + $0x60] sm:$0xff] %v35_v12  ;;  %v61_v38 = vld [vmem:[#allocation2 + $0x130] sm:$0xff]  ;;  %v62_v39 = vld [vmem:[#allocation2 + $0x138] sm:$0xff]  ;;  %v63_v40 = vld [vmem:[#allocation2 + $0x140] sm:$0xff] }
  0x13   :  { %472 = vst [vmem:[#allocation5 + $0x68] sm:$0xff] %v36_v13  ;;  %v64_v41 = vld [vmem:[#allocation2 + $0x148] sm:$0xff]  ;;  %v65_v42 = vld [vmem:[#allocation2 + $0x150] sm:$0xff]  ;;  %v66_v43 = vld [vmem:[#allocation2 + $0x158] sm:$0xff] }
  0x14   :  { %473 = vst [vmem:[#allocation5 + $0x70] sm:$0xff] %v37_v14  ;;  %v67_v44 = vld [vmem:[#allocation2 + $0x160] sm:$0xff]  ;;  %v68_v45 = vld [vmem:[#allocation2 + $0x168] sm:$0xff]  ;;  %v69_v46 = vld [vmem:[#allocation2 + $0x170] sm:$0xff] }
  0x15   :  { %474 = vst [vmem:[#allocation5 + $0x78] sm:$0xff] %v38_v15  ;;  %v70_v47 = vld [vmem:[#allocation2 + $0x178] sm:$0xff]  ;;  %v71_v48 = vld [vmem:[#allocation2 + $0x180] sm:$0xff]  ;;  %v72_v49 = vld [vmem:[#allocation2 + $0x188] sm:$0xff] }
  0x16   :  { %475 = vst [vmem:[#allocation5 + $0x80] sm:$0xff] %v39_v16  ;;  %v73_v50 = vld [vmem:[#allocation2 + $0x190] sm:$0xff]  ;;  %v74_v51 = vld [vmem:[#allocation2 + $0x198] sm:$0xff]  ;;  %v75_v52 = vld [vmem:[#allocation2 + $0x1a0] sm:$0xff] }
  0x17   :  { %476 = vst [vmem:[#allocation5 + $0x88] sm:$0xff] %v40_v17  ;;  %v76_v53 = vld [vmem:[#allocation2 + $0x1a8] sm:$0xff]  ;;  %v77_v54 = vld [vmem:[#allocation2 + $0x1b0] sm:$0xff]  ;;  %v78_v55 = vld [vmem:[#allocation2 + $0x1b8] sm:$0xff] }
  0x18   :  { %477 = vst [vmem:[#allocation5 + $0x90] sm:$0xff] %v41_v18  ;;  %v79_v56 = vld [vmem:[#allocation2 + $0x1c0] sm:$0xff]  ;;  %v80_v57 = vld [vmem:[#allocation2 + $0x1c8] sm:$0xff]  ;;  %v81_v58 = vld [vmem:[#allocation2 + $0x1d0] sm:$0xff] }
  0x19   :  { %478 = vst [vmem:[#allocation5 + $0x98] sm:$0xff] %v42_v19  ;;  %v82_v59 = vld [vmem:[#allocation2 + $0x1d8] sm:$0xff]  ;;  %v83_v60 = vld [vmem:[#allocation2 + $0x1e0] sm:$0xff]  ;;  %v84_v61 = vld [vmem:[#allocation2 + $0x1e8] sm:$0xff] }
  0x1a   :  { %479 = vst [vmem:[#allocation5 + $0xa0] sm:$0xff] %v43_v20  ;;  %v85_v62 = vld [vmem:[#allocation2 + $0x1f0] sm:$0xff]  ;;  %v86_v63 = vld [vmem:[#allocation2 + $0x1f8] sm:$0xff]  ;;  %v87_v0 = vld [vmem:[#allocation2 + $0x200] sm:$0xff] }
  0x1b   :  { %480 = vst [vmem:[#allocation5 + $0xa8] sm:$0xff] %v44_v21  ;;  %v88_v1 = vld [vmem:[#allocation2 + $0x208] sm:$0xff]  ;;  %v89_v2 = vld [vmem:[#allocation2 + $0x210] sm:$0xff]  ;;  %v90_v3 = vld [vmem:[#allocation2 + $0x218] sm:$0xff] }
  0x1c   :  { %481 = vst [vmem:[#allocation5 + $0xb0] sm:$0xff] %v45_v22  ;;  %v91_v4 = vld [vmem:[#allocation2 + $0x220] sm:$0xff]  ;;  %v92_v5 = vld [vmem:[#allocation2 + $0x228] sm:$0xff]  ;;  %v93_v6 = vld [vmem:[#allocation2 + $0x230] sm:$0xff] }
  0x1d   :  { %482 = vst [vmem:[#allocation5 + $0xb8] sm:$0xff] %v46_v23  ;;  %v94_v7 = vld [vmem:[#allocation2 + $0x238] sm:$0xff]  ;;  %v95_v8 = vld [vmem:[#allocation2 + $0x240] sm:$0xff]  ;;  %v96_v9 = vld [vmem:[#allocation2 + $0x248] sm:$0xff] }
  0x1e   :  { %483 = vst [vmem:[#allocation5 + $0xc0] sm:$0xff] %v47_v24  ;;  %v97_v10 = vld [vmem:[#allocation2 + $0x250] sm:$0xff]  ;;  %v98_v11 = vld [vmem:[#allocation2 + $0x258] sm:$0xff]  ;;  %v99_v12 = vld [vmem:[#allocation2 + $0x260] sm:$0xff] }
  0x1f   :  { %484 = vst [vmem:[#allocation5 + $0xc8] sm:$0xff] %v48_v25  ;;  %v100_v13 = vld [vmem:[#allocation2 + $0x268] sm:$0xff]  ;;  %v101_v14 = vld [vmem:[#allocation2 + $0x270] sm:$0xff]  ;;  %v102_v15 = vld [vmem:[#allocation2 + $0x278] sm:$0xff] }
  0x20   :  { %485 = vst [vmem:[#allocation5 + $0xd0] sm:$0xff] %v49_v26  ;;  %v103_v16 = vld [vmem:[#allocation2 + $0x280] sm:$0xff]  ;;  %v104_v17 = vld [vmem:[#allocation2 + $0x288] sm:$0xff]  ;;  %v105_v18 = vld [vmem:[#allocation2 + $0x290] sm:$0xff] }
  0x21   :  { %486 = vst [vmem:[#allocation5 + $0xd8] sm:$0xff] %v50_v27  ;;  %v106_v19 = vld [vmem:[#allocation2 + $0x298] sm:$0xff]  ;;  %v107_v20 = vld [vmem:[#allocation2 + $0x2a0] sm:$0xff]  ;;  %v108_v21 = vld [vmem:[#allocation2 + $0x2a8] sm:$0xff] }
  0x22   :  { %487 = vst [vmem:[#allocation5 + $0xe0] sm:$0xff] %v51_v28  ;;  %v109_v22 = vld [vmem:[#allocation2 + $0x2b0] sm:$0xff]  ;;  %v110_v23 = vld [vmem:[#allocation2 + $0x2b8] sm:$0xff]  ;;  %v111_v24 = vld [vmem:[#allocation2 + $0x2c0] sm:$0xff] }
  0x23   :  { %488 = vst [vmem:[#allocation5 + $0xe8] sm:$0xff] %v52_v29  ;;  %v112_v25 = vld [vmem:[#allocation2 + $0x2c8] sm:$0xff]  ;;  %v113_v26 = vld [vmem:[#allocation2 + $0x2d0] sm:$0xff]  ;;  %v114_v27 = vld [vmem:[#allocation2 + $0x2d8] sm:$0xff] }
  0x24   :  { %489 = vst [vmem:[#allocation5 + $0xf0] sm:$0xff] %v53_v30  ;;  %v115_v28 = vld [vmem:[#allocation2 + $0x2e0] sm:$0xff]  ;;  %v116_v29 = vld [vmem:[#allocation2 + $0x2e8] sm:$0xff]  ;;  %v117_v30 = vld [vmem:[#allocation2 + $0x2f0] sm:$0xff] }
  0x25   :  { %490 = vst [vmem:[#allocation5 + $0xf8] sm:$0xff] %v54_v31  ;;  %v118_v31 = vld [vmem:[#allocation2 + $0x2f8] sm:$0xff] }
  0x26   :  { %491 = vst [vmem:[#allocation5 + $0x100] sm:$0xff] %v55_v32  ;;  %v119_v32 = vld [vmem:[#allocation2 + $0x300] sm:$0xff] }
  0x27   :  { %492 = vst [vmem:[#allocation5 + $0x108] sm:$0xff] %v56_v33  ;;  %v120_v33 = vld [vmem:[#allocation2 + $0x308] sm:$0xff] }
  0x28   :  { %493 = vst [vmem:[#allocation5 + $0x110] sm:$0xff] %v57_v34  ;;  %v121_v34 = vld [vmem:[#allocation2 + $0x310] sm:$0xff] }
  0x29   :  { %494 = vst [vmem:[#allocation5 + $0x118] sm:$0xff] %v58_v35  ;;  %v122_v35 = vld [vmem:[#allocation2 + $0x318] sm:$0xff] }
  0x2a   :  { %495 = vst [vmem:[#allocation5 + $0x120] sm:$0xff] %v59_v36  ;;  %v123_v36 = vld [vmem:[#allocation2 + $0x320] sm:$0xff] }
  0x2b   :  { %496 = vst [vmem:[#allocation5 + $0x128] sm:$0xff] %v60_v37  ;;  %v124_v37 = vld [vmem:[#allocation2 + $0x328] sm:$0xff] }
  0x2c   :  { %497 = vst [vmem:[#allocation5 + $0x130] sm:$0xff] %v61_v38  ;;  %v125_v38 = vld [vmem:[#allocation2 + $0x330] sm:$0xff] }
  0x2d   :  { %498 = vst [vmem:[#allocation5 + $0x138] sm:$0xff] %v62_v39  ;;  %v126_v39 = vld [vmem:[#allocation2 + $0x338] sm:$0xff] }
  0x2e   :  { %499 = vst [vmem:[#allocation5 + $0x140] sm:$0xff] %v63_v40  ;;  %v127_v40 = vld [vmem:[#allocation2 + $0x340] sm:$0xff] }
  0x2f   :  { %500 = vst [vmem:[#allocation5 + $0x148] sm:$0xff] %v64_v41  ;;  %v128_v41 = vld [vmem:[#allocation2 + $0x348] sm:$0xff] }
  0x30   :  { %501 = vst [vmem:[#allocation5 + $0x150] sm:$0xff] %v65_v42  ;;  %v129_v42 = vld [vmem:[#allocation2 + $0x350] sm:$0xff] }
  0x31   :  { %502 = vst [vmem:[#allocation5 + $0x158] sm:$0xff] %v66_v43  ;;  %v130_v43 = vld [vmem:[#allocation2 + $0x358] sm:$0xff] }
  0x32   :  { %503 = vst [vmem:[#allocation5 + $0x160] sm:$0xff] %v67_v44  ;;  %v131_v44 = vld [vmem:[#allocation2 + $0x360] sm:$0xff] }
  0x33   :  { %504 = vst [vmem:[#allocation5 + $0x168] sm:$0xff] %v68_v45  ;;  %v132_v45 = vld [vmem:[#allocation2 + $0x368] sm:$0xff] }
  0x34   :  { %505 = vst [vmem:[#allocation5 + $0x170] sm:$0xff] %v69_v46  ;;  %v133_v46 = vld [vmem:[#allocation2 + $0x370] sm:$0xff] }
  0x35   :  { %506 = vst [vmem:[#allocation5 + $0x178] sm:$0xff] %v70_v47  ;;  %v134_v47 = vld [vmem:[#allocation2 + $0x378] sm:$0xff] }
  0x36   :  { %507 = vst [vmem:[#allocation5 + $0x180] sm:$0xff] %v71_v48  ;;  %v135_v48 = vld [vmem:[#allocation2 + $0x380] sm:$0xff] }
  0x37   :  { %508 = vst [vmem:[#allocation5 + $0x188] sm:$0xff] %v72_v49  ;;  %v136_v49 = vld [vmem:[#allocation2 + $0x388] sm:$0xff] }
  0x38   :  { %509 = vst [vmem:[#allocation5 + $0x190] sm:$0xff] %v73_v50  ;;  %v137_v50 = vld [vmem:[#allocation2 + $0x390] sm:$0xff] }
  0x39   :  { %510 = vst [vmem:[#allocation5 + $0x198] sm:$0xff] %v74_v51  ;;  %v138_v51 = vld [vmem:[#allocation2 + $0x398] sm:$0xff] }
  0x3a   :  { %511 = vst [vmem:[#allocation5 + $0x1a0] sm:$0xff] %v75_v52  ;;  %v139_v52 = vld [vmem:[#allocation2 + $0x3a0] sm:$0xff] }
  0x3b   :  { %512 = vst [vmem:[#allocation5 + $0x1a8] sm:$0xff] %v76_v53  ;;  %v140_v53 = vld [vmem:[#allocation2 + $0x3a8] sm:$0xff] }
  0x3c   :  { %513 = vst [vmem:[#allocation5 + $0x1b0] sm:$0xff] %v77_v54  ;;  %v141_v54 = vld [vmem:[#allocation2 + $0x3b0] sm:$0xff] }
  0x3d   :  { %514 = vst [vmem:[#allocation5 + $0x1b8] sm:$0xff] %v78_v55  ;;  %v142_v55 = vld [vmem:[#allocation2 + $0x3b8] sm:$0xff] }
  0x3e   :  { %515 = vst [vmem:[#allocation5 + $0x1c0] sm:$0xff] %v79_v56  ;;  %v143_v56 = vld [vmem:[#allocation2 + $0x3c0] sm:$0xff] }
  0x3f   :  { %516 = vst [vmem:[#allocation5 + $0x1c8] sm:$0xff] %v80_v57  ;;  %v144_v57 = vld [vmem:[#allocation2 + $0x3c8] sm:$0xff] }
  0x40   :  { %517 = vst [vmem:[#allocation5 + $0x1d0] sm:$0xff] %v81_v58  ;;  %v145_v58 = vld [vmem:[#allocation2 + $0x3d0] sm:$0xff] }
  0x41   :  { %518 = vst [vmem:[#allocation5 + $0x1d8] sm:$0xff] %v82_v59  ;;  %v146_v59 = vld [vmem:[#allocation2 + $0x3d8] sm:$0xff] }
  0x42   :  { %519 = vst [vmem:[#allocation5 + $0x1e0] sm:$0xff] %v83_v60  ;;  %v147_v60 = vld [vmem:[#allocation2 + $0x3e0] sm:$0xff] }
  0x43   :  { %520 = vst [vmem:[#allocation5 + $0x1e8] sm:$0xff] %v84_v61  ;;  %v148_v61 = vld [vmem:[#allocation2 + $0x3e8] sm:$0xff] }
  0x44   :  { %521 = vst [vmem:[#allocation5 + $0x1f0] sm:$0xff] %v85_v62  ;;  %v149_v62 = vld [vmem:[#allocation2 + $0x3f0] sm:$0xff] }
  0x45   :  { %522 = vst [vmem:[#allocation5 + $0x1f8] sm:$0xff] %v86_v63  ;;  %v150_v63 = vld [vmem:[#allocation2 + $0x3f8] sm:$0xff] }
  0x46   :  { %523 = vst [vmem:[#allocation5 + $0x200] sm:$0xff] %v87_v0  ;;  %v151_v0 = vld [vmem:[#allocation2 + $0x400] sm:$0xff] }
  0x47   :  { %524 = vst [vmem:[#allocation5 + $0x208] sm:$0xff] %v88_v1  ;;  %v152_v1 = vld [vmem:[#allocation2 + $0x408] sm:$0xff] }
  0x48   :  { %525 = vst [vmem:[#allocation5 + $0x210] sm:$0xff] %v89_v2  ;;  %v153_v2 = vld [vmem:[#allocation2 + $0x410] sm:$0xff] }
  0x49   :  { %526 = vst [vmem:[#allocation5 + $0x218] sm:$0xff] %v90_v3  ;;  %v154_v3 = vld [vmem:[#allocation2 + $0x418] sm:$0xff] }
  0x4a   :  { %527 = vst [vmem:[#allocation5 + $0x220] sm:$0xff] %v91_v4  ;;  %v155_v4 = vld [vmem:[#allocation2 + $0x420] sm:$0xff] }
  0x4b   :  { %528 = vst [vmem:[#allocation5 + $0x228] sm:$0xff] %v92_v5  ;;  %v156_v5 = vld [vmem:[#allocation2 + $0x428] sm:$0xff] }
  0x4c   :  { %529 = vst [vmem:[#allocation5 + $0x230] sm:$0xff] %v93_v6  ;;  %v157_v6 = vld [vmem:[#allocation2 + $0x430] sm:$0xff] }
  0x4d   :  { %530 = vst [vmem:[#allocation5 + $0x238] sm:$0xff] %v94_v7  ;;  %v158_v7 = vld [vmem:[#allocation2 + $0x438] sm:$0xff] }
  0x4e   :  { %531 = vst [vmem:[#allocation5 + $0x240] sm:$0xff] %v95_v8  ;;  %v159_v8 = vld [vmem:[#allocation2 + $0x440] sm:$0xff] }
  0x4f   :  { %532 = vst [vmem:[#allocation5 + $0x248] sm:$0xff] %v96_v9  ;;  %v160_v9 = vld [vmem:[#allocation2 + $0x448] sm:$0xff] }
  0x50   :  { %533 = vst [vmem:[#allocation5 + $0x250] sm:$0xff] %v97_v10  ;;  %v161_v10 = vld [vmem:[#allocation2 + $0x450] sm:$0xff] }
  0x51   :  { %534 = vst [vmem:[#allocation5 + $0x258] sm:$0xff] %v98_v11  ;;  %v162_v11 = vld [vmem:[#allocation2 + $0x458] sm:$0xff] }
  0x52   :  { %535 = vst [vmem:[#allocation5 + $0x260] sm:$0xff] %v99_v12  ;;  %v163_v12 = vld [vmem:[#allocation2 + $0x460] sm:$0xff] }
  0x53   :  { %536 = vst [vmem:[#allocation5 + $0x268] sm:$0xff] %v100_v13  ;;  %v164_v13 = vld [vmem:[#allocation2 + $0x468] sm:$0xff] }
  0x54   :  { %537 = vst [vmem:[#allocation5 + $0x270] sm:$0xff] %v101_v14  ;;  %v165_v14 = vld [vmem:[#allocation2 + $0x470] sm:$0xff] }
  0x55   :  { %538 = vst [vmem:[#allocation5 + $0x278] sm:$0xff] %v102_v15  ;;  %v166_v15 = vld [vmem:[#allocation2 + $0x478] sm:$0xff] }
  0x56   :  { %539 = vst [vmem:[#allocation5 + $0x280] sm:$0xff] %v103_v16  ;;  %v167_v16 = vld [vmem:[#allocation2 + $0x480] sm:$0xff] }
  0x57   :  { %540 = vst [vmem:[#allocation5 + $0x288] sm:$0xff] %v104_v17  ;;  %v168_v17 = vld [vmem:[#allocation2 + $0x488] sm:$0xff] }
  0x58   :  { %541 = vst [vmem:[#allocation5 + $0x290] sm:$0xff] %v105_v18  ;;  %v169_v18 = vld [vmem:[#allocation2 + $0x490] sm:$0xff] }
  0x59   :  { %542 = vst [vmem:[#allocation5 + $0x298] sm:$0xff] %v106_v19  ;;  %v170_v19 = vld [vmem:[#allocation2 + $0x498] sm:$0xff] }
  0x5a   :  { %543 = vst [vmem:[#allocation5 + $0x2a0] sm:$0xff] %v107_v20  ;;  %v171_v20 = vld [vmem:[#allocation2 + $0x4a0] sm:$0xff] }
  0x5b   :  { %544 = vst [vmem:[#allocation5 + $0x2a8] sm:$0xff] %v108_v21  ;;  %v172_v21 = vld [vmem:[#allocation2 + $0x4a8] sm:$0xff] }
  0x5c   :  { %545 = vst [vmem:[#allocation5 + $0x2b0] sm:$0xff] %v109_v22  ;;  %v173_v22 = vld [vmem:[#allocation2 + $0x4b0] sm:$0xff] }
  0x5d   :  { %546 = vst [vmem:[#allocation5 + $0x2b8] sm:$0xff] %v110_v23  ;;  %v174_v23 = vld [vmem:[#allocation2 + $0x4b8] sm:$0xff] }
  0x5e   :  { %547 = vst [vmem:[#allocation5 + $0x2c0] sm:$0xff] %v111_v24  ;;  %v175_v24 = vld [vmem:[#allocation2 + $0x4c0] sm:$0xff] }
  0x5f   :  { %548 = vst [vmem:[#allocation5 + $0x2c8] sm:$0xff] %v112_v25  ;;  %v176_v25 = vld [vmem:[#allocation2 + $0x4c8] sm:$0xff] }
  0x60   :  { %549 = vst [vmem:[#allocation5 + $0x2d0] sm:$0xff] %v113_v26  ;;  %v177_v26 = vld [vmem:[#allocation2 + $0x4d0] sm:$0xff] }
  0x61   :  { %550 = vst [vmem:[#allocation5 + $0x2d8] sm:$0xff] %v114_v27  ;;  %v178_v27 = vld [vmem:[#allocation2 + $0x4d8] sm:$0xff] }
  0x62   :  { %551 = vst [vmem:[#allocation5 + $0x2e0] sm:$0xff] %v115_v28  ;;  %v179_v28 = vld [vmem:[#allocation2 + $0x4e0] sm:$0xff] }
  0x63   :  { %552 = vst [vmem:[#allocation5 + $0x2e8] sm:$0xff] %v116_v29  ;;  %v180_v29 = vld [vmem:[#allocation2 + $0x4e8] sm:$0xff] }
  0x64   :  { %553 = vst [vmem:[#allocation5 + $0x2f0] sm:$0xff] %v117_v30  ;;  %v181_v30 = vld [vmem:[#allocation2 + $0x4f0] sm:$0xff] }
  0x65   :  { %554 = vst [vmem:[#allocation5 + $0x2f8] sm:$0xff] %v118_v31  ;;  %v182_v31 = vld [vmem:[#allocation2 + $0x4f8] sm:$0xff] }
  0x66   :  { %555 = vst [vmem:[#allocation5 + $0x300] sm:$0xff] %v119_v32  ;;  %v183_v32 = vld [vmem:[#allocation2 + $0x500] sm:$0xff] }
  0x67   :  { %556 = vst [vmem:[#allocation5 + $0x308] sm:$0xff] %v120_v33  ;;  %v184_v33 = vld [vmem:[#allocation2 + $0x508] sm:$0xff] }
  0x68   :  { %557 = vst [vmem:[#allocation5 + $0x310] sm:$0xff] %v121_v34  ;;  %v185_v34 = vld [vmem:[#allocation2 + $0x510] sm:$0xff] }
  0x69   :  { %558 = vst [vmem:[#allocation5 + $0x318] sm:$0xff] %v122_v35  ;;  %v186_v35 = vld [vmem:[#allocation2 + $0x518] sm:$0xff] }
  0x6a   :  { %559 = vst [vmem:[#allocation5 + $0x320] sm:$0xff] %v123_v36  ;;  %v187_v36 = vld [vmem:[#allocation2 + $0x520] sm:$0xff] }
  0x6b   :  { %560 = vst [vmem:[#allocation5 + $0x328] sm:$0xff] %v124_v37  ;;  %v188_v37 = vld [vmem:[#allocation2 + $0x528] sm:$0xff] }
  0x6c   :  { %561 = vst [vmem:[#allocation5 + $0x330] sm:$0xff] %v125_v38  ;;  %v189_v38 = vld [vmem:[#allocation2 + $0x530] sm:$0xff] }
  0x6d   :  { %562 = vst [vmem:[#allocation5 + $0x338] sm:$0xff] %v126_v39  ;;  %v190_v39 = vld [vmem:[#allocation2 + $0x538] sm:$0xff] }
  0x6e   :  { %563 = vst [vmem:[#allocation5 + $0x340] sm:$0xff] %v127_v40  ;;  %v191_v40 = vld [vmem:[#allocation2 + $0x540] sm:$0xff] }
  0x6f   :  { %564 = vst [vmem:[#allocation5 + $0x348] sm:$0xff] %v128_v41  ;;  %v192_v41 = vld [vmem:[#allocation2 + $0x548] sm:$0xff] }
  0x70   :  { %565 = vst [vmem:[#allocation5 + $0x350] sm:$0xff] %v129_v42  ;;  %v193_v42 = vld [vmem:[#allocation2 + $0x550] sm:$0xff] }
  0x71   :  { %566 = vst [vmem:[#allocation5 + $0x358] sm:$0xff] %v130_v43  ;;  %v194_v43 = vld [vmem:[#allocation2 + $0x558] sm:$0xff] }
  0x72   :  { %567 = vst [vmem:[#allocation5 + $0x360] sm:$0xff] %v131_v44  ;;  %v195_v44 = vld [vmem:[#allocation2 + $0x560] sm:$0xff] }
  0x73   :  { %568 = vst [vmem:[#allocation5 + $0x368] sm:$0xff] %v132_v45  ;;  %v196_v45 = vld [vmem:[#allocation2 + $0x568] sm:$0xff] }
  0x74   :  { %569 = vst [vmem:[#allocation5 + $0x370] sm:$0xff] %v133_v46  ;;  %v197_v46 = vld [vmem:[#allocation2 + $0x570] sm:$0xff] }
  0x75   :  { %570 = vst [vmem:[#allocation5 + $0x378] sm:$0xff] %v134_v47  ;;  %v198_v47 = vld [vmem:[#allocation2 + $0x578] sm:$0xff] }
  0x76   :  { %571 = vst [vmem:[#allocation5 + $0x380] sm:$0xff] %v135_v48  ;;  %v199_v48 = vld [vmem:[#allocation2 + $0x580] sm:$0xff] }
  0x77   :  { %572 = vst [vmem:[#allocation5 + $0x388] sm:$0xff] %v136_v49  ;;  %v200_v49 = vld [vmem:[#allocation2 + $0x588] sm:$0xff] }
  0x78   :  { %573 = vst [vmem:[#allocation5 + $0x390] sm:$0xff] %v137_v50  ;;  %v201_v50 = vld [vmem:[#allocation2 + $0x590] sm:$0xff] }
  0x79   :  { %574 = vst [vmem:[#allocation5 + $0x398] sm:$0xff] %v138_v51  ;;  %v202_v51 = vld [vmem:[#allocation2 + $0x598] sm:$0xff] }
  0x7a   :  { %575 = vst [vmem:[#allocation5 + $0x3a0] sm:$0xff] %v139_v52  ;;  %v203_v52 = vld [vmem:[#allocation2 + $0x5a0] sm:$0xff] }
  0x7b   :  { %576 = vst [vmem:[#allocation5 + $0x3a8] sm:$0xff] %v140_v53  ;;  %v204_v53 = vld [vmem:[#allocation2 + $0x5a8] sm:$0xff] }
  0x7c   :  { %577 = vst [vmem:[#allocation5 + $0x3b0] sm:$0xff] %v141_v54  ;;  %v205_v54 = vld [vmem:[#allocation2 + $0x5b0] sm:$0xff] }
  0x7d   :  { %578 = vst [vmem:[#allocation5 + $0x3b8] sm:$0xff] %v142_v55  ;;  %v206_v55 = vld [vmem:[#allocation2 + $0x5b8] sm:$0xff] }
  0x7e   :  { %579 = vst [vmem:[#allocation5 + $0x3c0] sm:$0xff] %v143_v56  ;;  %v207_v56 = vld [vmem:[#allocation2 + $0x5c0] sm:$0xff] }
  0x7f   :  { %580 = vst [vmem:[#allocation5 + $0x3c8] sm:$0xff] %v144_v57  ;;  %v208_v57 = vld [vmem:[#allocation2 + $0x5c8] sm:$0xff] }
  0x80   :  { %581 = vst [vmem:[#allocation5 + $0x3d0] sm:$0xff] %v145_v58  ;;  %v209_v58 = vld [vmem:[#allocation2 + $0x5d0] sm:$0xff] }
  0x81   :  { %582 = vst [vmem:[#allocation5 + $0x3d8] sm:$0xff] %v146_v59  ;;  %v210_v59 = vld [vmem:[#allocation2 + $0x5d8] sm:$0xff] }
  0x82   :  { %583 = vst [vmem:[#allocation5 + $0x3e0] sm:$0xff] %v147_v60  ;;  %v211_v60 = vld [vmem:[#allocation2 + $0x5e0] sm:$0xff] }
  0x83   :  { %584 = vst [vmem:[#allocation5 + $0x3e8] sm:$0xff] %v148_v61  ;;  %v212_v61 = vld [vmem:[#allocation2 + $0x5e8] sm:$0xff] }
  0x84   :  { %585 = vst [vmem:[#allocation5 + $0x3f0] sm:$0xff] %v149_v62  ;;  %v213_v62 = vld [vmem:[#allocation2 + $0x5f0] sm:$0xff] }
  0x85   :  { %586 = vst [vmem:[#allocation5 + $0x3f8] sm:$0xff] %v150_v63  ;;  %v214_v63 = vld [vmem:[#allocation2 + $0x5f8] sm:$0xff] }
  0x86   :  { %587 = vst [vmem:[#allocation5 + $0x400] sm:$0xff] %v151_v0  ;;  %v215_v0 = vld [vmem:[#allocation2 + $0x600] sm:$0xff] }
  0x87   :  { %588 = vst [vmem:[#allocation5 + $0x408] sm:$0xff] %v152_v1  ;;  %v216_v1 = vld [vmem:[#allocation2 + $0x608] sm:$0xff] }
  0x88   :  { %589 = vst [vmem:[#allocation5 + $0x410] sm:$0xff] %v153_v2  ;;  %v217_v2 = vld [vmem:[#allocation2 + $0x610] sm:$0xff] }
  0x89   :  { %590 = vst [vmem:[#allocation5 + $0x418] sm:$0xff] %v154_v3  ;;  %v218_v3 = vld [vmem:[#allocation2 + $0x618] sm:$0xff] }
  0x8a   :  { %591 = vst [vmem:[#allocation5 + $0x420] sm:$0xff] %v155_v4  ;;  %v219_v4 = vld [vmem:[#allocation2 + $0x620] sm:$0xff] }
  0x8b   :  { %592 = vst [vmem:[#allocation5 + $0x428] sm:$0xff] %v156_v5  ;;  %v220_v5 = vld [vmem:[#allocation2 + $0x628] sm:$0xff] }
  0x8c   :  { %593 = vst [vmem:[#allocation5 + $0x430] sm:$0xff] %v157_v6  ;;  %v221_v6 = vld [vmem:[#allocation2 + $0x630] sm:$0xff] }
  0x8d   :  { %594 = vst [vmem:[#allocation5 + $0x438] sm:$0xff] %v158_v7  ;;  %v222_v7 = vld [vmem:[#allocation2 + $0x638] sm:$0xff] }
  0x8e   :  { %595 = vst [vmem:[#allocation5 + $0x440] sm:$0xff] %v159_v8  ;;  %v223_v8 = vld [vmem:[#allocation2 + $0x640] sm:$0xff] }
  0x8f   :  { %596 = vst [vmem:[#allocation5 + $0x448] sm:$0xff] %v160_v9  ;;  %v224_v9 = vld [vmem:[#allocation2 + $0x648] sm:$0xff] }
  0x90   :  { %597 = vst [vmem:[#allocation5 + $0x450] sm:$0xff] %v161_v10  ;;  %v225_v10 = vld [vmem:[#allocation2 + $0x650] sm:$0xff] }
  0x91   :  { %598 = vst [vmem:[#allocation5 + $0x458] sm:$0xff] %v162_v11  ;;  %v226_v11 = vld [vmem:[#allocation2 + $0x658] sm:$0xff] }
  0x92   :  { %599 = vst [vmem:[#allocation5 + $0x460] sm:$0xff] %v163_v12  ;;  %v227_v12 = vld [vmem:[#allocation2 + $0x660] sm:$0xff] }
  0x93   :  { %600 = vst [vmem:[#allocation5 + $0x468] sm:$0xff] %v164_v13  ;;  %v228_v13 = vld [vmem:[#allocation2 + $0x668] sm:$0xff] }
  0x94   :  { %601 = vst [vmem:[#allocation5 + $0x470] sm:$0xff] %v165_v14  ;;  %v229_v14 = vld [vmem:[#allocation2 + $0x670] sm:$0xff] }
  0x95   :  { %602 = vst [vmem:[#allocation5 + $0x478] sm:$0xff] %v166_v15  ;;  %v230_v15 = vld [vmem:[#allocation2 + $0x678] sm:$0xff] }
  0x96   :  { %603 = vst [vmem:[#allocation5 + $0x480] sm:$0xff] %v167_v16  ;;  %v231_v16 = vld [vmem:[#allocation2 + $0x680] sm:$0xff] }
  0x97   :  { %604 = vst [vmem:[#allocation5 + $0x488] sm:$0xff] %v168_v17  ;;  %v232_v17 = vld [vmem:[#allocation2 + $0x688] sm:$0xff] }
  0x98   :  { %605 = vst [vmem:[#allocation5 + $0x490] sm:$0xff] %v169_v18  ;;  %v233_v18 = vld [vmem:[#allocation2 + $0x690] sm:$0xff] }
  0x99   :  { %606 = vst [vmem:[#allocation5 + $0x498] sm:$0xff] %v170_v19  ;;  %v234_v19 = vld [vmem:[#allocation2 + $0x698] sm:$0xff] }
  0x9a   :  { %607 = vst [vmem:[#allocation5 + $0x4a0] sm:$0xff] %v171_v20  ;;  %v235_v20 = vld [vmem:[#allocation2 + $0x6a0] sm:$0xff] }
  0x9b   :  { %608 = vst [vmem:[#allocation5 + $0x4a8] sm:$0xff] %v172_v21  ;;  %v236_v21 = vld [vmem:[#allocation2 + $0x6a8] sm:$0xff] }
  0x9c   :  { %609 = vst [vmem:[#allocation5 + $0x4b0] sm:$0xff] %v173_v22  ;;  %v237_v22 = vld [vmem:[#allocation2 + $0x6b0] sm:$0xff] }
  0x9d   :  { %610 = vst [vmem:[#allocation5 + $0x4b8] sm:$0xff] %v174_v23  ;;  %v238_v23 = vld [vmem:[#allocation2 + $0x6b8] sm:$0xff] }
  0x9e   :  { %611 = vst [vmem:[#allocation5 + $0x4c0] sm:$0xff] %v175_v24  ;;  %v239_v24 = vld [vmem:[#allocation2 + $0x6c0] sm:$0xff] }
  0x9f   :  { %612 = vst [vmem:[#allocation5 + $0x4c8] sm:$0xff] %v176_v25  ;;  %v240_v25 = vld [vmem:[#allocation2 + $0x6c8] sm:$0xff] }
  0xa0   :  { %613 = vst [vmem:[#allocation5 + $0x4d0] sm:$0xff] %v177_v26  ;;  %v241_v26 = vld [vmem:[#allocation2 + $0x6d0] sm:$0xff] }
  0xa1   :  { %614 = vst [vmem:[#allocation5 + $0x4d8] sm:$0xff] %v178_v27  ;;  %v242_v27 = vld [vmem:[#allocation2 + $0x6d8] sm:$0xff] }
  0xa2   :  { %615 = vst [vmem:[#allocation5 + $0x4e0] sm:$0xff] %v179_v28  ;;  %v243_v28 = vld [vmem:[#allocation2 + $0x6e0] sm:$0xff] }
  0xa3   :  { %616 = vst [vmem:[#allocation5 + $0x4e8] sm:$0xff] %v180_v29  ;;  %v244_v29 = vld [vmem:[#allocation2 + $0x6e8] sm:$0xff] }
  0xa4   :  { %617 = vst [vmem:[#allocation5 + $0x4f0] sm:$0xff] %v181_v30  ;;  %v245_v30 = vld [vmem:[#allocation2 + $0x6f0] sm:$0xff] }
  0xa5   :  { %618 = vst [vmem:[#allocation5 + $0x4f8] sm:$0xff] %v182_v31  ;;  %v246_v31 = vld [vmem:[#allocation2 + $0x6f8] sm:$0xff] }
  0xa6   :  { %619 = vst [vmem:[#allocation5 + $0x500] sm:$0xff] %v183_v32  ;;  %v247_v32 = vld [vmem:[#allocation2 + $0x700] sm:$0xff] }
  0xa7   :  { %620 = vst [vmem:[#allocation5 + $0x508] sm:$0xff] %v184_v33  ;;  %v248_v33 = vld [vmem:[#allocation2 + $0x708] sm:$0xff] }
  0xa8   :  { %621 = vst [vmem:[#allocation5 + $0x510] sm:$0xff] %v185_v34  ;;  %v249_v34 = vld [vmem:[#allocation2 + $0x710] sm:$0xff] }
  0xa9   :  { %622 = vst [vmem:[#allocation5 + $0x518] sm:$0xff] %v186_v35  ;;  %v250_v35 = vld [vmem:[#allocation2 + $0x718] sm:$0xff] }
  0xaa   :  { %623 = vst [vmem:[#allocation5 + $0x520] sm:$0xff] %v187_v36  ;;  %v251_v36 = vld [vmem:[#allocation2 + $0x720] sm:$0xff] }
  0xab   :  { %624 = vst [vmem:[#allocation5 + $0x528] sm:$0xff] %v188_v37  ;;  %v252_v37 = vld [vmem:[#allocation2 + $0x728] sm:$0xff] }
  0xac   :  { %625 = vst [vmem:[#allocation5 + $0x530] sm:$0xff] %v189_v38  ;;  %v253_v38 = vld [vmem:[#allocation2 + $0x730] sm:$0xff] }
  0xad   :  { %626 = vst [vmem:[#allocation5 + $0x538] sm:$0xff] %v190_v39  ;;  %v254_v39 = vld [vmem:[#allocation2 + $0x738] sm:$0xff] }
  0xae   :  { %627 = vst [vmem:[#allocation5 + $0x540] sm:$0xff] %v191_v40  ;;  %v255_v40 = vld [vmem:[#allocation2 + $0x740] sm:$0xff] }
  0xaf   :  { %628 = vst [vmem:[#allocation5 + $0x548] sm:$0xff] %v192_v41  ;;  %v256_v41 = vld [vmem:[#allocation2 + $0x748] sm:$0xff] }
  0xb0   :  { %629 = vst [vmem:[#allocation5 + $0x550] sm:$0xff] %v193_v42  ;;  %v257_v42 = vld [vmem:[#allocation2 + $0x750] sm:$0xff] }
  0xb1   :  { %630 = vst [vmem:[#allocation5 + $0x558] sm:$0xff] %v194_v43  ;;  %v258_v43 = vld [vmem:[#allocation2 + $0x758] sm:$0xff] }
  0xb2   :  { %631 = vst [vmem:[#allocation5 + $0x560] sm:$0xff] %v195_v44  ;;  %v259_v44 = vld [vmem:[#allocation2 + $0x760] sm:$0xff] }
  0xb3   :  { %632 = vst [vmem:[#allocation5 + $0x568] sm:$0xff] %v196_v45  ;;  %v260_v45 = vld [vmem:[#allocation2 + $0x768] sm:$0xff] }
  0xb4   :  { %633 = vst [vmem:[#allocation5 + $0x570] sm:$0xff] %v197_v46  ;;  %v261_v46 = vld [vmem:[#allocation2 + $0x770] sm:$0xff] }
  0xb5   :  { %634 = vst [vmem:[#allocation5 + $0x578] sm:$0xff] %v198_v47  ;;  %v262_v47 = vld [vmem:[#allocation2 + $0x778] sm:$0xff] }
  0xb6   :  { %635 = vst [vmem:[#allocation5 + $0x580] sm:$0xff] %v199_v48  ;;  %v263_v48 = vld [vmem:[#allocation2 + $0x780] sm:$0xff] }
  0xb7   :  { %636 = vst [vmem:[#allocation5 + $0x588] sm:$0xff] %v200_v49  ;;  %v264_v49 = vld [vmem:[#allocation2 + $0x788] sm:$0xff] }
  0xb8   :  { %637 = vst [vmem:[#allocation5 + $0x590] sm:$0xff] %v201_v50  ;;  %v265_v50 = vld [vmem:[#allocation2 + $0x790] sm:$0xff] }
  0xb9   :  { %638 = vst [vmem:[#allocation5 + $0x598] sm:$0xff] %v202_v51  ;;  %v266_v51 = vld [vmem:[#allocation2 + $0x798] sm:$0xff] }
  0xba   :  { %639 = vst [vmem:[#allocation5 + $0x5a0] sm:$0xff] %v203_v52  ;;  %v267_v52 = vld [vmem:[#allocation2 + $0x7a0] sm:$0xff] }
  0xbb   :  { %640 = vst [vmem:[#allocation5 + $0x5a8] sm:$0xff] %v204_v53  ;;  %v268_v53 = vld [vmem:[#allocation2 + $0x7a8] sm:$0xff] }
  0xbc   :  { %641 = vst [vmem:[#allocation5 + $0x5b0] sm:$0xff] %v205_v54  ;;  %v269_v54 = vld [vmem:[#allocation2 + $0x7b0] sm:$0xff] }
  0xbd   :  { %642 = vst [vmem:[#allocation5 + $0x5b8] sm:$0xff] %v206_v55  ;;  %v270_v55 = vld [vmem:[#allocation2 + $0x7b8] sm:$0xff] }
  0xbe   :  { %643 = vst [vmem:[#allocation5 + $0x5c0] sm:$0xff] %v207_v56  ;;  %v271_v56 = vld [vmem:[#allocation2 + $0x7c0] sm:$0xff] }
  0xbf   :  { %644 = vst [vmem:[#allocation5 + $0x5c8] sm:$0xff] %v208_v57  ;;  %v272_v57 = vld [vmem:[#allocation2 + $0x7c8] sm:$0xff] }
  0xc0   :  { %645 = vst [vmem:[#allocation5 + $0x5d0] sm:$0xff] %v209_v58  ;;  %v273_v58 = vld [vmem:[#allocation2 + $0x7d0] sm:$0xff] }
  0xc1   :  { %646 = vst [vmem:[#allocation5 + $0x5d8] sm:$0xff] %v210_v59  ;;  %v274_v59 = vld [vmem:[#allocation2 + $0x7d8] sm:$0xff] }
  0xc2   :  { %647 = vst [vmem:[#allocation5 + $0x5e0] sm:$0xff] %v211_v60  ;;  %v275_v60 = vld [vmem:[#allocation2 + $0x7e0] sm:$0xff] }
  0xc3   :  { %648 = vst [vmem:[#allocation5 + $0x5e8] sm:$0xff] %v212_v61  ;;  %v276_v61 = vld [vmem:[#allocation2 + $0x7e8] sm:$0xff] }
  0xc4   :  { %649 = vst [vmem:[#allocation5 + $0x5f0] sm:$0xff] %v213_v62  ;;  %v277_v62 = vld [vmem:[#allocation2 + $0x7f0] sm:$0xff] }
  0xc5   :  { %650 = vst [vmem:[#allocation5 + $0x5f8] sm:$0xff] %v214_v63  ;;  %v278_v63 = vld [vmem:[#allocation2 + $0x7f8] sm:$0xff] }
  0xc6   :  { %651 = vst [vmem:[#allocation5 + $0x600] sm:$0xff] %v215_v0  ;;  %v279_v0 = vld [vmem:[#allocation2 + $0x800] sm:$0xff] }
  0xc7   :  { %652 = vst [vmem:[#allocation5 + $0x608] sm:$0xff] %v216_v1  ;;  %v280_v1 = vld [vmem:[#allocation2 + $0x808] sm:$0xff] }
  0xc8   :  { %653 = vst [vmem:[#allocation5 + $0x610] sm:$0xff] %v217_v2  ;;  %v281_v2 = vld [vmem:[#allocation2 + $0x810] sm:$0xff] }
  0xc9   :  { %654 = vst [vmem:[#allocation5 + $0x618] sm:$0xff] %v218_v3  ;;  %v282_v3 = vld [vmem:[#allocation2 + $0x818] sm:$0xff] }
  0xca   :  { %655 = vst [vmem:[#allocation5 + $0x620] sm:$0xff] %v219_v4  ;;  %v283_v4 = vld [vmem:[#allocation2 + $0x820] sm:$0xff] }
  0xcb   :  { %656 = vst [vmem:[#allocation5 + $0x628] sm:$0xff] %v220_v5  ;;  %v284_v5 = vld [vmem:[#allocation2 + $0x828] sm:$0xff] }
  0xcc   :  { %657 = vst [vmem:[#allocation5 + $0x630] sm:$0xff] %v221_v6  ;;  %v285_v6 = vld [vmem:[#allocation2 + $0x830] sm:$0xff] }
  0xcd   :  { %658 = vst [vmem:[#allocation5 + $0x638] sm:$0xff] %v222_v7  ;;  %v286_v7 = vld [vmem:[#allocation2 + $0x838] sm:$0xff] }
  0xce   :  { %659 = vst [vmem:[#allocation5 + $0x640] sm:$0xff] %v223_v8  ;;  %v287_v8 = vld [vmem:[#allocation2 + $0x840] sm:$0xff] }
  0xcf   :  { %660 = vst [vmem:[#allocation5 + $0x648] sm:$0xff] %v224_v9  ;;  %v288_v9 = vld [vmem:[#allocation2 + $0x848] sm:$0xff] }
  0xd0   :  { %661 = vst [vmem:[#allocation5 + $0x650] sm:$0xff] %v225_v10  ;;  %v289_v10 = vld [vmem:[#allocation2 + $0x850] sm:$0xff] }
  0xd1   :  { %662 = vst [vmem:[#allocation5 + $0x658] sm:$0xff] %v226_v11  ;;  %v290_v11 = vld [vmem:[#allocation2 + $0x858] sm:$0xff] }
  0xd2   :  { %663 = vst [vmem:[#allocation5 + $0x660] sm:$0xff] %v227_v12  ;;  %v291_v12 = vld [vmem:[#allocation2 + $0x860] sm:$0xff] }
  0xd3   :  { %664 = vst [vmem:[#allocation5 + $0x668] sm:$0xff] %v228_v13  ;;  %v292_v13 = vld [vmem:[#allocation2 + $0x868] sm:$0xff] }
  0xd4   :  { %665 = vst [vmem:[#allocation5 + $0x670] sm:$0xff] %v229_v14  ;;  %v293_v14 = vld [vmem:[#allocation2 + $0x870] sm:$0xff] }
  0xd5   :  { %666 = vst [vmem:[#allocation5 + $0x678] sm:$0xff] %v230_v15  ;;  %v294_v15 = vld [vmem:[#allocation2 + $0x878] sm:$0xff] }
  0xd6   :  { %667 = vst [vmem:[#allocation5 + $0x680] sm:$0xff] %v231_v16  ;;  %v295_v16 = vld [vmem:[#allocation2 + $0x880] sm:$0xff] }
  0xd7   :  { %668 = vst [vmem:[#allocation5 + $0x688] sm:$0xff] %v232_v17  ;;  %v296_v17 = vld [vmem:[#allocation2 + $0x888] sm:$0xff] }
  0xd8   :  { %669 = vst [vmem:[#allocation5 + $0x690] sm:$0xff] %v233_v18  ;;  %v297_v18 = vld [vmem:[#allocation2 + $0x890] sm:$0xff] }
  0xd9   :  { %670 = vst [vmem:[#allocation5 + $0x698] sm:$0xff] %v234_v19  ;;  %v298_v19 = vld [vmem:[#allocation2 + $0x898] sm:$0xff] }
  0xda   :  { %671 = vst [vmem:[#allocation5 + $0x6a0] sm:$0xff] %v235_v20  ;;  %v299_v20 = vld [vmem:[#allocation2 + $0x8a0] sm:$0xff] }
  0xdb   :  { %672 = vst [vmem:[#allocation5 + $0x6a8] sm:$0xff] %v236_v21  ;;  %v300_v21 = vld [vmem:[#allocation2 + $0x8a8] sm:$0xff] }
  0xdc   :  { %673 = vst [vmem:[#allocation5 + $0x6b0] sm:$0xff] %v237_v22  ;;  %v301_v22 = vld [vmem:[#allocation2 + $0x8b0] sm:$0xff] }
  0xdd   :  { %674 = vst [vmem:[#allocation5 + $0x6b8] sm:$0xff] %v238_v23  ;;  %v302_v23 = vld [vmem:[#allocation2 + $0x8b8] sm:$0xff] }
  0xde   :  { %675 = vst [vmem:[#allocation5 + $0x6c0] sm:$0xff] %v239_v24  ;;  %v303_v24 = vld [vmem:[#allocation2 + $0x8c0] sm:$0xff] }
  0xdf   :  { %676 = vst [vmem:[#allocation5 + $0x6c8] sm:$0xff] %v240_v25  ;;  %v304_v25 = vld [vmem:[#allocation2 + $0x8c8] sm:$0xff] }
  0xe0   :  { %677 = vst [vmem:[#allocation5 + $0x6d0] sm:$0xff] %v241_v26  ;;  %v305_v26 = vld [vmem:[#allocation2 + $0x8d0] sm:$0xff] }
  0xe1   :  { %678 = vst [vmem:[#allocation5 + $0x6d8] sm:$0xff] %v242_v27  ;;  %v306_v27 = vld [vmem:[#allocation2 + $0x8d8] sm:$0xff] }
  0xe2   :  { %679 = vst [vmem:[#allocation5 + $0x6e0] sm:$0xff] %v243_v28  ;;  %v307_v28 = vld [vmem:[#allocation2 + $0x8e0] sm:$0xff] }
  0xe3   :  { %680 = vst [vmem:[#allocation5 + $0x6e8] sm:$0xff] %v244_v29  ;;  %v308_v29 = vld [vmem:[#allocation2 + $0x8e8] sm:$0xff] }
  0xe4   :  { %681 = vst [vmem:[#allocation5 + $0x6f0] sm:$0xff] %v245_v30  ;;  %v309_v30 = vld [vmem:[#allocation2 + $0x8f0] sm:$0xff] }
  0xe5   :  { %682 = vst [vmem:[#allocation5 + $0x6f8] sm:$0xff] %v246_v31  ;;  %v310_v31 = vld [vmem:[#allocation2 + $0x8f8] sm:$0xff] }
  0xe6   :  { %683 = vst [vmem:[#allocation5 + $0x700] sm:$0xff] %v247_v32  ;;  %v311_v32 = vld [vmem:[#allocation2 + $0x900] sm:$0xff] }
  0xe7   :  { %684 = vst [vmem:[#allocation5 + $0x708] sm:$0xff] %v248_v33  ;;  %v312_v33 = vld [vmem:[#allocation2 + $0x908] sm:$0xff] }
  0xe8   :  { %685 = vst [vmem:[#allocation5 + $0x710] sm:$0xff] %v249_v34  ;;  %v313_v34 = vld [vmem:[#allocation2 + $0x910] sm:$0xff] }
  0xe9   :  { %686 = vst [vmem:[#allocation5 + $0x718] sm:$0xff] %v250_v35  ;;  %v314_v35 = vld [vmem:[#allocation2 + $0x918] sm:$0xff] }
  0xea   :  { %687 = vst [vmem:[#allocation5 + $0x720] sm:$0xff] %v251_v36  ;;  %v315_v36 = vld [vmem:[#allocation2 + $0x920] sm:$0xff] }
  0xeb   :  { %688 = vst [vmem:[#allocation5 + $0x728] sm:$0xff] %v252_v37  ;;  %v316_v37 = vld [vmem:[#allocation2 + $0x928] sm:$0xff] }
  0xec   :  { %689 = vst [vmem:[#allocation5 + $0x730] sm:$0xff] %v253_v38  ;;  %v317_v38 = vld [vmem:[#allocation2 + $0x930] sm:$0xff] }
  0xed   :  { %690 = vst [vmem:[#allocation5 + $0x738] sm:$0xff] %v254_v39  ;;  %v318_v39 = vld [vmem:[#allocation2 + $0x938] sm:$0xff] }
  0xee   :  { %691 = vst [vmem:[#allocation5 + $0x740] sm:$0xff] %v255_v40  ;;  %v319_v40 = vld [vmem:[#allocation2 + $0x940] sm:$0xff] }
  0xef   :  { %692 = vst [vmem:[#allocation5 + $0x748] sm:$0xff] %v256_v41  ;;  %v320_v41 = vld [vmem:[#allocation2 + $0x948] sm:$0xff] }
  0xf0   :  { %693 = vst [vmem:[#allocation5 + $0x750] sm:$0xff] %v257_v42  ;;  %v321_v42 = vld [vmem:[#allocation2 + $0x950] sm:$0xff] }
  0xf1   :  { %694 = vst [vmem:[#allocation5 + $0x758] sm:$0xff] %v258_v43  ;;  %v322_v43 = vld [vmem:[#allocation2 + $0x958] sm:$0xff] }
  0xf2   :  { %695 = vst [vmem:[#allocation5 + $0x760] sm:$0xff] %v259_v44  ;;  %v323_v44 = vld [vmem:[#allocation2 + $0x960] sm:$0xff] }
  0xf3   :  { %696 = vst [vmem:[#allocation5 + $0x768] sm:$0xff] %v260_v45  ;;  %v324_v45 = vld [vmem:[#allocation2 + $0x968] sm:$0xff] }
  0xf4   :  { %697 = vst [vmem:[#allocation5 + $0x770] sm:$0xff] %v261_v46  ;;  %v325_v46 = vld [vmem:[#allocation2 + $0x970] sm:$0xff] }
  0xf5   :  { %698 = vst [vmem:[#allocation5 + $0x778] sm:$0xff] %v262_v47  ;;  %v326_v47 = vld [vmem:[#allocation2 + $0x978] sm:$0xff] }
  0xf6   :  { %699 = vst [vmem:[#allocation5 + $0x780] sm:$0xff] %v263_v48  ;;  %v327_v48 = vld [vmem:[#allocation2 + $0x980] sm:$0xff] }
  0xf7   :  { %700 = vst [vmem:[#allocation5 + $0x788] sm:$0xff] %v264_v49  ;;  %v328_v49 = vld [vmem:[#allocation2 + $0x988] sm:$0xff] }
  0xf8   :  { %701 = vst [vmem:[#allocation5 + $0x790] sm:$0xff] %v265_v50  ;;  %v329_v50 = vld [vmem:[#allocation2 + $0x990] sm:$0xff] }
  0xf9   :  { %702 = vst [vmem:[#allocation5 + $0x798] sm:$0xff] %v266_v51  ;;  %v330_v51 = vld [vmem:[#allocation2 + $0x998] sm:$0xff] }
  0xfa   :  { %703 = vst [vmem:[#allocation5 + $0x7a0] sm:$0xff] %v267_v52  ;;  %v331_v52 = vld [vmem:[#allocation2 + $0x9a0] sm:$0xff] }
  0xfb   :  { %704 = vst [vmem:[#allocation5 + $0x7a8] sm:$0xff] %v268_v53  ;;  %v332_v53 = vld [vmem:[#allocation2 + $0x9a8] sm:$0xff] }
  0xfc   :  { %705 = vst [vmem:[#allocation5 + $0x7b0] sm:$0xff] %v269_v54  ;;  %v333_v54 = vld [vmem:[#allocation2 + $0x9b0] sm:$0xff] }
  0xfd   :  { %706 = vst [vmem:[#allocation5 + $0x7b8] sm:$0xff] %v270_v55  ;;  %v334_v55 = vld [vmem:[#allocation2 + $0x9b8] sm:$0xff] }
  0xfe   :  { %707 = vst [vmem:[#allocation5 + $0x7c0] sm:$0xff] %v271_v56  ;;  %v335_v56 = vld [vmem:[#allocation2 + $0x9c0] sm:$0xff] }
  0xff   :  { %708 = vst [vmem:[#allocation5 + $0x7c8] sm:$0xff] %v272_v57  ;;  %v336_v57 = vld [vmem:[#allocation2 + $0x9c8] sm:$0xff] }
 0x100   :  { %709 = vst [vmem:[#allocation5 + $0x7d0] sm:$0xff] %v273_v58  ;;  %v337_v58 = vld [vmem:[#allocation2 + $0x9d0] sm:$0xff] }
 0x101   :  { %710 = vst [vmem:[#allocation5 + $0x7d8] sm:$0xff] %v274_v59  ;;  %v338_v59 = vld [vmem:[#allocation2 + $0x9d8] sm:$0xff] }
 0x102   :  { %711 = vst [vmem:[#allocation5 + $0x7e0] sm:$0xff] %v275_v60  ;;  %v339_v60 = vld [vmem:[#allocation2 + $0x9e0] sm:$0xff] }
 0x103   :  { %712 = vst [vmem:[#allocation5 + $0x7e8] sm:$0xff] %v276_v61  ;;  %v340_v61 = vld [vmem:[#allocation2 + $0x9e8] sm:$0xff] }
 0x104   :  { %713 = vst [vmem:[#allocation5 + $0x7f0] sm:$0xff] %v277_v62  ;;  %v341_v62 = vld [vmem:[#allocation2 + $0x9f0] sm:$0xff] }
 0x105   :  { %714 = vst [vmem:[#allocation5 + $0x7f8] sm:$0xff] %v278_v63  ;;  %v342_v63 = vld [vmem:[#allocation2 + $0x9f8] sm:$0xff] }
 0x106   :  { %715 = vst [vmem:[#allocation5 + $0x800] sm:$0xff] %v279_v0  ;;  %v343_v0 = vld [vmem:[#allocation2 + $0xa00] sm:$0xff] }
 0x107   :  { %716 = vst [vmem:[#allocation5 + $0x808] sm:$0xff] %v280_v1  ;;  %v344_v1 = vld [vmem:[#allocation2 + $0xa08] sm:$0xff] }
 0x108   :  { %717 = vst [vmem:[#allocation5 + $0x810] sm:$0xff] %v281_v2  ;;  %v345_v2 = vld [vmem:[#allocation2 + $0xa10] sm:$0xff] }
 0x109   :  { %718 = vst [vmem:[#allocation5 + $0x818] sm:$0xff] %v282_v3  ;;  %v346_v3 = vld [vmem:[#allocation2 + $0xa18] sm:$0xff] }
 0x10a   :  { %719 = vst [vmem:[#allocation5 + $0x820] sm:$0xff] %v283_v4  ;;  %v347_v4 = vld [vmem:[#allocation2 + $0xa20] sm:$0xff] }
 0x10b   :  { %720 = vst [vmem:[#allocation5 + $0x828] sm:$0xff] %v284_v5  ;;  %v348_v5 = vld [vmem:[#allocation2 + $0xa28] sm:$0xff] }
 0x10c   :  { %721 = vst [vmem:[#allocation5 + $0x830] sm:$0xff] %v285_v6  ;;  %v349_v6 = vld [vmem:[#allocation2 + $0xa30] sm:$0xff] }
 0x10d   :  { %722 = vst [vmem:[#allocation5 + $0x838] sm:$0xff] %v286_v7  ;;  %v350_v7 = vld [vmem:[#allocation2 + $0xa38] sm:$0xff] }
 0x10e   :  { %723 = vst [vmem:[#allocation5 + $0x840] sm:$0xff] %v287_v8  ;;  %v351_v8 = vld [vmem:[#allocation2 + $0xa40] sm:$0xff] }
 0x10f   :  { %724 = vst [vmem:[#allocation5 + $0x848] sm:$0xff] %v288_v9  ;;  %v352_v9 = vld [vmem:[#allocation2 + $0xa48] sm:$0xff] }
 0x110   :  { %725 = vst [vmem:[#allocation5 + $0x850] sm:$0xff] %v289_v10  ;;  %v353_v10 = vld [vmem:[#allocation2 + $0xa50] sm:$0xff] }
 0x111   :  { %726 = vst [vmem:[#allocation5 + $0x858] sm:$0xff] %v290_v11  ;;  %v354_v11 = vld [vmem:[#allocation2 + $0xa58] sm:$0xff] }
 0x112   :  { %727 = vst [vmem:[#allocation5 + $0x860] sm:$0xff] %v291_v12  ;;  %v355_v12 = vld [vmem:[#allocation2 + $0xa60] sm:$0xff] }
 0x113   :  { %728 = vst [vmem:[#allocation5 + $0x868] sm:$0xff] %v292_v13  ;;  %v356_v13 = vld [vmem:[#allocation2 + $0xa68] sm:$0xff] }
 0x114   :  { %729 = vst [vmem:[#allocation5 + $0x870] sm:$0xff] %v293_v14  ;;  %v357_v14 = vld [vmem:[#allocation2 + $0xa70] sm:$0xff] }
 0x115   :  { %730 = vst [vmem:[#allocation5 + $0x878] sm:$0xff] %v294_v15  ;;  %v358_v15 = vld [vmem:[#allocation2 + $0xa78] sm:$0xff] }
 0x116   :  { %731 = vst [vmem:[#allocation5 + $0x880] sm:$0xff] %v295_v16  ;;  %v359_v16 = vld [vmem:[#allocation2 + $0xa80] sm:$0xff] }
 0x117   :  { %732 = vst [vmem:[#allocation5 + $0x888] sm:$0xff] %v296_v17  ;;  %v360_v17 = vld [vmem:[#allocation2 + $0xa88] sm:$0xff] }
 0x118   :  { %733 = vst [vmem:[#allocation5 + $0x890] sm:$0xff] %v297_v18  ;;  %v361_v18 = vld [vmem:[#allocation2 + $0xa90] sm:$0xff] }
 0x119   :  { %734 = vst [vmem:[#allocation5 + $0x898] sm:$0xff] %v298_v19  ;;  %v362_v19 = vld [vmem:[#allocation2 + $0xa98] sm:$0xff] }
 0x11a   :  { %735 = vst [vmem:[#allocation5 + $0x8a0] sm:$0xff] %v299_v20  ;;  %v363_v20 = vld [vmem:[#allocation2 + $0xaa0] sm:$0xff] }
 0x11b   :  { %736 = vst [vmem:[#allocation5 + $0x8a8] sm:$0xff] %v300_v21  ;;  %v364_v21 = vld [vmem:[#allocation2 + $0xaa8] sm:$0xff] }
 0x11c   :  { %737 = vst [vmem:[#allocation5 + $0x8b0] sm:$0xff] %v301_v22  ;;  %v365_v22 = vld [vmem:[#allocation2 + $0xab0] sm:$0xff] }
 0x11d   :  { %738 = vst [vmem:[#allocation5 + $0x8b8] sm:$0xff] %v302_v23  ;;  %v366_v23 = vld [vmem:[#allocation2 + $0xab8] sm:$0xff] }
 0x11e   :  { %739 = vst [vmem:[#allocation5 + $0x8c0] sm:$0xff] %v303_v24  ;;  %v367_v24 = vld [vmem:[#allocation2 + $0xac0] sm:$0xff] }
 0x11f   :  { %740 = vst [vmem:[#allocation5 + $0x8c8] sm:$0xff] %v304_v25  ;;  %v368_v25 = vld [vmem:[#allocation2 + $0xac8] sm:$0xff] }
 0x120   :  { %741 = vst [vmem:[#allocation5 + $0x8d0] sm:$0xff] %v305_v26  ;;  %v369_v26 = vld [vmem:[#allocation2 + $0xad0] sm:$0xff] }
 0x121   :  { %742 = vst [vmem:[#allocation5 + $0x8d8] sm:$0xff] %v306_v27  ;;  %v370_v27 = vld [vmem:[#allocation2 + $0xad8] sm:$0xff] }
 0x122   :  { %743 = vst [vmem:[#allocation5 + $0x8e0] sm:$0xff] %v307_v28  ;;  %v371_v28 = vld [vmem:[#allocation2 + $0xae0] sm:$0xff] }
 0x123   :  { %744 = vst [vmem:[#allocation5 + $0x8e8] sm:$0xff] %v308_v29  ;;  %v372_v29 = vld [vmem:[#allocation2 + $0xae8] sm:$0xff] }
 0x124   :  { %745 = vst [vmem:[#allocation5 + $0x8f0] sm:$0xff] %v309_v30  ;;  %v373_v30 = vld [vmem:[#allocation2 + $0xaf0] sm:$0xff] }
 0x125   :  { %746 = vst [vmem:[#allocation5 + $0x8f8] sm:$0xff] %v310_v31  ;;  %v374_v31 = vld [vmem:[#allocation2 + $0xaf8] sm:$0xff] }
 0x126   :  { %747 = vst [vmem:[#allocation5 + $0x900] sm:$0xff] %v311_v32  ;;  %v375_v32 = vld [vmem:[#allocation2 + $0xb00] sm:$0xff] }
 0x127   :  { %748 = vst [vmem:[#allocation5 + $0x908] sm:$0xff] %v312_v33  ;;  %v376_v33 = vld [vmem:[#allocation2 + $0xb08] sm:$0xff] }
 0x128   :  { %749 = vst [vmem:[#allocation5 + $0x910] sm:$0xff] %v313_v34  ;;  %v377_v34 = vld [vmem:[#allocation2 + $0xb10] sm:$0xff] }
 0x129   :  { %750 = vst [vmem:[#allocation5 + $0x918] sm:$0xff] %v314_v35  ;;  %v378_v35 = vld [vmem:[#allocation2 + $0xb18] sm:$0xff] }
 0x12a   :  { %751 = vst [vmem:[#allocation5 + $0x920] sm:$0xff] %v315_v36  ;;  %v379_v36 = vld [vmem:[#allocation2 + $0xb20] sm:$0xff] }
 0x12b   :  { %752 = vst [vmem:[#allocation5 + $0x928] sm:$0xff] %v316_v37  ;;  %v380_v37 = vld [vmem:[#allocation2 + $0xb28] sm:$0xff] }
 0x12c   :  { %753 = vst [vmem:[#allocation5 + $0x930] sm:$0xff] %v317_v38  ;;  %v381_v38 = vld [vmem:[#allocation2 + $0xb30] sm:$0xff] }
 0x12d   :  { %754 = vst [vmem:[#allocation5 + $0x938] sm:$0xff] %v318_v39  ;;  %v382_v39 = vld [vmem:[#allocation2 + $0xb38] sm:$0xff] }
 0x12e   :  { %755 = vst [vmem:[#allocation5 + $0x940] sm:$0xff] %v319_v40  ;;  %v383_v40 = vld [vmem:[#allocation2 + $0xb40] sm:$0xff] }
 0x12f   :  { %756 = vst [vmem:[#allocation5 + $0x948] sm:$0xff] %v320_v41  ;;  %v384_v41 = vld [vmem:[#allocation2 + $0xb48] sm:$0xff] }
 0x130   :  { %757 = vst [vmem:[#allocation5 + $0x950] sm:$0xff] %v321_v42  ;;  %v385_v42 = vld [vmem:[#allocation2 + $0xb50] sm:$0xff] }
 0x131   :  { %758 = vst [vmem:[#allocation5 + $0x958] sm:$0xff] %v322_v43  ;;  %v386_v43 = vld [vmem:[#allocation2 + $0xb58] sm:$0xff] }
 0x132   :  { %759 = vst [vmem:[#allocation5 + $0x960] sm:$0xff] %v323_v44  ;;  %v387_v44 = vld [vmem:[#allocation2 + $0xb60] sm:$0xff] }
 0x133   :  { %760 = vst [vmem:[#allocation5 + $0x968] sm:$0xff] %v324_v45  ;;  %v388_v45 = vld [vmem:[#allocation2 + $0xb68] sm:$0xff] }
 0x134   :  { %761 = vst [vmem:[#allocation5 + $0x970] sm:$0xff] %v325_v46  ;;  %v389_v46 = vld [vmem:[#allocation2 + $0xb70] sm:$0xff] }
 0x135   :  { %762 = vst [vmem:[#allocation5 + $0x978] sm:$0xff] %v326_v47  ;;  %v390_v47 = vld [vmem:[#allocation2 + $0xb78] sm:$0xff] }
 0x136   :  { %763 = vst [vmem:[#allocation5 + $0x980] sm:$0xff] %v327_v48  ;;  %v391_v48 = vld [vmem:[#allocation2 + $0xb80] sm:$0xff] }
 0x137   :  { %764 = vst [vmem:[#allocation5 + $0x988] sm:$0xff] %v328_v49  ;;  %v392_v49 = vld [vmem:[#allocation2 + $0xb88] sm:$0xff] }
 0x138   :  { %765 = vst [vmem:[#allocation5 + $0x990] sm:$0xff] %v329_v50  ;;  %v393_v50 = vld [vmem:[#allocation2 + $0xb90] sm:$0xff] }
 0x139   :  { %766 = vst [vmem:[#allocation5 + $0x998] sm:$0xff] %v330_v51  ;;  %v394_v51 = vld [vmem:[#allocation2 + $0xb98] sm:$0xff] }
 0x13a   :  { %767 = vst [vmem:[#allocation5 + $0x9a0] sm:$0xff] %v331_v52  ;;  %v395_v52 = vld [vmem:[#allocation2 + $0xba0] sm:$0xff] }
 0x13b   :  { %768 = vst [vmem:[#allocation5 + $0x9a8] sm:$0xff] %v332_v53  ;;  %v396_v53 = vld [vmem:[#allocation2 + $0xba8] sm:$0xff] }
 0x13c   :  { %769 = vst [vmem:[#allocation5 + $0x9b0] sm:$0xff] %v333_v54  ;;  %v397_v54 = vld [vmem:[#allocation2 + $0xbb0] sm:$0xff] }
 0x13d   :  { %770 = vst [vmem:[#allocation5 + $0x9b8] sm:$0xff] %v334_v55  ;;  %v398_v55 = vld [vmem:[#allocation2 + $0xbb8] sm:$0xff] }
 0x13e   :  { %771 = vst [vmem:[#allocation5 + $0x9c0] sm:$0xff] %v335_v56  ;;  %v399_v56 = vld [vmem:[#allocation2 + $0xbc0] sm:$0xff] }
 0x13f   :  { %772 = vst [vmem:[#allocation5 + $0x9c8] sm:$0xff] %v336_v57  ;;  %v400_v57 = vld [vmem:[#allocation2 + $0xbc8] sm:$0xff] }
 0x140   :  { %773 = vst [vmem:[#allocation5 + $0x9d0] sm:$0xff] %v337_v58  ;;  %v401_v58 = vld [vmem:[#allocation2 + $0xbd0] sm:$0xff] }
 0x141   :  { %774 = vst [vmem:[#allocation5 + $0x9d8] sm:$0xff] %v338_v59  ;;  %v402_v59 = vld [vmem:[#allocation2 + $0xbd8] sm:$0xff] }
 0x142   :  { %775 = vst [vmem:[#allocation5 + $0x9e0] sm:$0xff] %v339_v60  ;;  %v403_v60 = vld [vmem:[#allocation2 + $0xbe0] sm:$0xff] }
 0x143   :  { %776 = vst [vmem:[#allocation5 + $0x9e8] sm:$0xff] %v340_v61  ;;  %v404_v61 = vld [vmem:[#allocation2 + $0xbe8] sm:$0xff] }
 0x144   :  { %777 = vst [vmem:[#allocation5 + $0x9f0] sm:$0xff] %v341_v62  ;;  %v405_v62 = vld [vmem:[#allocation2 + $0xbf0] sm:$0xff] }
 0x145   :  { %778 = vst [vmem:[#allocation5 + $0x9f8] sm:$0xff] %v342_v63  ;;  %v406_v63 = vld [vmem:[#allocation2 + $0xbf8] sm:$0xff] }
 0x146   :  { %779 = vst [vmem:[#allocation5 + $0xa00] sm:$0xff] %v343_v0  ;;  %v407_v0 = vld [vmem:[#allocation2 + $0xc00] sm:$0xff] }
 0x147   :  { %780 = vst [vmem:[#allocation5 + $0xa08] sm:$0xff] %v344_v1  ;;  %v408_v1 = vld [vmem:[#allocation2 + $0xc08] sm:$0xff] }
 0x148   :  { %781 = vst [vmem:[#allocation5 + $0xa10] sm:$0xff] %v345_v2  ;;  %v409_v2 = vld [vmem:[#allocation2 + $0xc10] sm:$0xff] }
 0x149   :  { %782 = vst [vmem:[#allocation5 + $0xa18] sm:$0xff] %v346_v3  ;;  %v410_v3 = vld [vmem:[#allocation2 + $0xc18] sm:$0xff] }
 0x14a   :  { %783 = vst [vmem:[#allocation5 + $0xa20] sm:$0xff] %v347_v4  ;;  %v411_v4 = vld [vmem:[#allocation2 + $0xc20] sm:$0xff] }
 0x14b   :  { %784 = vst [vmem:[#allocation5 + $0xa28] sm:$0xff] %v348_v5  ;;  %v412_v5 = vld [vmem:[#allocation2 + $0xc28] sm:$0xff] }
 0x14c   :  { %785 = vst [vmem:[#allocation5 + $0xa30] sm:$0xff] %v349_v6  ;;  %v413_v6 = vld [vmem:[#allocation2 + $0xc30] sm:$0xff] }
 0x14d   :  { %786 = vst [vmem:[#allocation5 + $0xa38] sm:$0xff] %v350_v7  ;;  %v414_v7 = vld [vmem:[#allocation2 + $0xc38] sm:$0xff] }
 0x14e   :  { %787 = vst [vmem:[#allocation5 + $0xa40] sm:$0xff] %v351_v8  ;;  %v415_v8 = vld [vmem:[#allocation2 + $0xc40] sm:$0xff] }
 0x14f   :  { %788 = vst [vmem:[#allocation5 + $0xa48] sm:$0xff] %v352_v9  ;;  %v416_v9 = vld [vmem:[#allocation2 + $0xc48] sm:$0xff] }
 0x150   :  { %789 = vst [vmem:[#allocation5 + $0xa50] sm:$0xff] %v353_v10  ;;  %v417_v10 = vld [vmem:[#allocation2 + $0xc50] sm:$0xff] }
 0x151   :  { %790 = vst [vmem:[#allocation5 + $0xa58] sm:$0xff] %v354_v11  ;;  %v418_v11 = vld [vmem:[#allocation2 + $0xc58] sm:$0xff] }
 0x152   :  { %791 = vst [vmem:[#allocation5 + $0xa60] sm:$0xff] %v355_v12  ;;  %v419_v12 = vld [vmem:[#allocation2 + $0xc60] sm:$0xff] }
 0x153   :  { %792 = vst [vmem:[#allocation5 + $0xa68] sm:$0xff] %v356_v13  ;;  %v420_v13 = vld [vmem:[#allocation2 + $0xc68] sm:$0xff] }
 0x154   :  { %793 = vst [vmem:[#allocation5 + $0xa70] sm:$0xff] %v357_v14  ;;  %v421_v14 = vld [vmem:[#allocation2 + $0xc70] sm:$0xff] }
 0x155   :  { %794 = vst [vmem:[#allocation5 + $0xa78] sm:$0xff] %v358_v15  ;;  %v422_v15 = vld [vmem:[#allocation2 + $0xc78] sm:$0xff] }
 0x156   :  { %795 = vst [vmem:[#allocation5 + $0xa80] sm:$0xff] %v359_v16  ;;  %v423_v16 = vld [vmem:[#allocation2 + $0xc80] sm:$0xff] }
 0x157   :  { %796 = vst [vmem:[#allocation5 + $0xa88] sm:$0xff] %v360_v17  ;;  %v424_v17 = vld [vmem:[#allocation2 + $0xc88] sm:$0xff] }
 0x158   :  { %797 = vst [vmem:[#allocation5 + $0xa90] sm:$0xff] %v361_v18  ;;  %v425_v18 = vld [vmem:[#allocation2 + $0xc90] sm:$0xff] }
 0x159   :  { %798 = vst [vmem:[#allocation5 + $0xa98] sm:$0xff] %v362_v19  ;;  %v426_v19 = vld [vmem:[#allocation2 + $0xc98] sm:$0xff] }
 0x15a   :  { %799 = vst [vmem:[#allocation5 + $0xaa0] sm:$0xff] %v363_v20  ;;  %v427_v20 = vld [vmem:[#allocation2 + $0xca0] sm:$0xff] }
 0x15b   :  { %800 = vst [vmem:[#allocation5 + $0xaa8] sm:$0xff] %v364_v21  ;;  %v428_v21 = vld [vmem:[#allocation2 + $0xca8] sm:$0xff] }
 0x15c   :  { %801 = vst [vmem:[#allocation5 + $0xab0] sm:$0xff] %v365_v22  ;;  %v429_v22 = vld [vmem:[#allocation2 + $0xcb0] sm:$0xff] }
 0x15d   :  { %802 = vst [vmem:[#allocation5 + $0xab8] sm:$0xff] %v366_v23  ;;  %v430_v23 = vld [vmem:[#allocation2 + $0xcb8] sm:$0xff] }
 0x15e   :  { %803 = vst [vmem:[#allocation5 + $0xac0] sm:$0xff] %v367_v24  ;;  %v431_v24 = vld [vmem:[#allocation2 + $0xcc0] sm:$0xff] }
 0x15f   :  { %804 = vst [vmem:[#allocation5 + $0xac8] sm:$0xff] %v368_v25  ;;  %v432_v25 = vld [vmem:[#allocation2 + $0xcc8] sm:$0xff] }
 0x160   :  { %805 = vst [vmem:[#allocation5 + $0xad0] sm:$0xff] %v369_v26  ;;  %v433_v26 = vld [vmem:[#allocation2 + $0xcd0] sm:$0xff] }
 0x161   :  { %806 = vst [vmem:[#allocation5 + $0xad8] sm:$0xff] %v370_v27  ;;  %v434_v27 = vld [vmem:[#allocation2 + $0xcd8] sm:$0xff] }
 0x162   :  { %807 = vst [vmem:[#allocation5 + $0xae0] sm:$0xff] %v371_v28  ;;  %v435_v28 = vld [vmem:[#allocation2 + $0xce0] sm:$0xff] }
 0x163   :  { %808 = vst [vmem:[#allocation5 + $0xae8] sm:$0xff] %v372_v29  ;;  %v436_v29 = vld [vmem:[#allocation2 + $0xce8] sm:$0xff] }
 0x164   :  { %809 = vst [vmem:[#allocation5 + $0xaf0] sm:$0xff] %v373_v30  ;;  %v437_v30 = vld [vmem:[#allocation2 + $0xcf0] sm:$0xff] }
 0x165   :  { %810 = vst [vmem:[#allocation5 + $0xaf8] sm:$0xff] %v374_v31  ;;  %v438_v31 = vld [vmem:[#allocation2 + $0xcf8] sm:$0xff] }
 0x166   :  { %811 = vst [vmem:[#allocation5 + $0xb00] sm:$0xff] %v375_v32  ;;  %v439_v32 = vld [vmem:[#allocation2 + $0xd00] sm:$0xff] }
 0x167   :  { %812 = vst [vmem:[#allocation5 + $0xb08] sm:$0xff] %v376_v33  ;;  %v440_v33 = vld [vmem:[#allocation2 + $0xd08] sm:$0xff] }
 0x168   :  { %813 = vst [vmem:[#allocation5 + $0xb10] sm:$0xff] %v377_v34  ;;  %v441_v34 = vld [vmem:[#allocation2 + $0xd10] sm:$0xff] }
 0x169   :  { %814 = vst [vmem:[#allocation5 + $0xb18] sm:$0xff] %v378_v35  ;;  %v442_v35 = vld [vmem:[#allocation2 + $0xd18] sm:$0xff] }
 0x16a   :  { %815 = vst [vmem:[#allocation5 + $0xb20] sm:$0xff] %v379_v36  ;;  %v443_v36 = vld [vmem:[#allocation2 + $0xd20] sm:$0xff] }
 0x16b   :  { %816 = vst [vmem:[#allocation5 + $0xb28] sm:$0xff] %v380_v37  ;;  %v444_v37 = vld [vmem:[#allocation2 + $0xd28] sm:$0xff] }
 0x16c   :  { %817 = vst [vmem:[#allocation5 + $0xb30] sm:$0xff] %v381_v38  ;;  %v445_v38 = vld [vmem:[#allocation2 + $0xd30] sm:$0xff] }
 0x16d   :  { %818 = vst [vmem:[#allocation5 + $0xb38] sm:$0xff] %v382_v39  ;;  %v446_v39 = vld [vmem:[#allocation2 + $0xd38] sm:$0xff] }
 0x16e   :  { %819 = vst [vmem:[#allocation5 + $0xb40] sm:$0xff] %v383_v40  ;;  %v447_v40 = vld [vmem:[#allocation2 + $0xd40] sm:$0xff] }
 0x16f   :  { %820 = vst [vmem:[#allocation5 + $0xb48] sm:$0xff] %v384_v41  ;;  %v448_v41 = vld [vmem:[#allocation2 + $0xd48] sm:$0xff] }
 0x170   :  { %821 = vst [vmem:[#allocation5 + $0xb50] sm:$0xff] %v385_v42  ;;  %v449_v42 = vld [vmem:[#allocation2 + $0xd50] sm:$0xff] }
 0x171   :  { %822 = vst [vmem:[#allocation5 + $0xb58] sm:$0xff] %v386_v43  ;;  %v450_v43 = vld [vmem:[#allocation2 + $0xd58] sm:$0xff] }
 0x172   :  { %823 = vst [vmem:[#allocation5 + $0xb60] sm:$0xff] %v387_v44  ;;  %v451_v44 = vld [vmem:[#allocation2 + $0xd60] sm:$0xff] }
 0x173   :  { %824 = vst [vmem:[#allocation5 + $0xb68] sm:$0xff] %v388_v45  ;;  %v452_v45 = vld [vmem:[#allocation2 + $0xd68] sm:$0xff] }
 0x174   :  { %825 = vst [vmem:[#allocation5 + $0xb70] sm:$0xff] %v389_v46  ;;  %v453_v46 = vld [vmem:[#allocation2 + $0xd70] sm:$0xff] }
 0x175   :  { %826 = vst [vmem:[#allocation5 + $0xb78] sm:$0xff] %v390_v47  ;;  %v454_v47 = vld [vmem:[#allocation2 + $0xd78] sm:$0xff] }
 0x176   :  { %827 = vst [vmem:[#allocation5 + $0xb80] sm:$0xff] %v391_v48  ;;  %v455_v48 = vld [vmem:[#allocation2 + $0xd80] sm:$0xff] }
 0x177   :  { %828 = vst [vmem:[#allocation5 + $0xb88] sm:$0xff] %v392_v49  ;;  %v456_v49 = vld [vmem:[#allocation2 + $0xd88] sm:$0xff] }
 0x178   :  { %829 = vst [vmem:[#allocation5 + $0xb90] sm:$0xff] %v393_v50  ;;  %v457_v50 = vld [vmem:[#allocation2 + $0xd90] sm:$0xff] }
 0x179   :  { %830 = vst [vmem:[#allocation5 + $0xb98] sm:$0xff] %v394_v51  ;;  %v458_v51 = vld [vmem:[#allocation2 + $0xd98] sm:$0x3] }
 0x17a   :  { %831 = vst [vmem:[#allocation5 + $0xba0] sm:$0xff] %v395_v52 }
 0x17b   :  { %832 = vst [vmem:[#allocation5 + $0xba8] sm:$0xff] %v396_v53 }
 0x17c   :  { %833 = vst [vmem:[#allocation5 + $0xbb0] sm:$0xff] %v397_v54 }
 0x17d   :  { %834 = vst [vmem:[#allocation5 + $0xbb8] sm:$0xff] %v398_v55 }
 0x17e   :  { %835 = vst [vmem:[#allocation5 + $0xbc0] sm:$0xff] %v399_v56 }
 0x17f   :  { %836 = vst [vmem:[#allocation5 + $0xbc8] sm:$0xff] %v400_v57 }
 0x180   :  { %837 = vst [vmem:[#allocation5 + $0xbd0] sm:$0xff] %v401_v58 }
 0x181   :  { %838 = vst [vmem:[#allocation5 + $0xbd8] sm:$0xff] %v402_v59 }
 0x182   :  { %839 = vst [vmem:[#allocation5 + $0xbe0] sm:$0xff] %v403_v60 }
 0x183   :  { %840 = vst [vmem:[#allocation5 + $0xbe8] sm:$0xff] %v404_v61 }
 0x184   :  { %841 = vst [vmem:[#allocation5 + $0xbf0] sm:$0xff] %v405_v62 }
 0x185   :  { %842 = vst [vmem:[#allocation5 + $0xbf8] sm:$0xff] %v406_v63 }
 0x186   :  { %843 = vst [vmem:[#allocation5 + $0xc00] sm:$0xff] %v407_v0 }
 0x187   :  { %844 = vst [vmem:[#allocation5 + $0xc08] sm:$0xff] %v408_v1 }
 0x188   :  { %845 = vst [vmem:[#allocation5 + $0xc10] sm:$0xff] %v409_v2 }
 0x189   :  { %846 = vst [vmem:[#allocation5 + $0xc18] sm:$0xff] %v410_v3 }
 0x18a   :  { %847 = vst [vmem:[#allocation5 + $0xc20] sm:$0xff] %v411_v4 }
 0x18b   :  { %848 = vst [vmem:[#allocation5 + $0xc28] sm:$0xff] %v412_v5 }
 0x18c   :  { %849 = vst [vmem:[#allocation5 + $0xc30] sm:$0xff] %v413_v6 }
 0x18d   :  { %850 = vst [vmem:[#allocation5 + $0xc38] sm:$0xff] %v414_v7 }
 0x18e   :  { %851 = vst [vmem:[#allocation5 + $0xc40] sm:$0xff] %v415_v8 }
 0x18f   :  { %852 = vst [vmem:[#allocation5 + $0xc48] sm:$0xff] %v416_v9 }
 0x190   :  { %853 = vst [vmem:[#allocation5 + $0xc50] sm:$0xff] %v417_v10 }
 0x191   :  { %854 = vst [vmem:[#allocation5 + $0xc58] sm:$0xff] %v418_v11 }
 0x192   :  { %855 = vst [vmem:[#allocation5 + $0xc60] sm:$0xff] %v419_v12 }
 0x193   :  { %856 = vst [vmem:[#allocation5 + $0xc68] sm:$0xff] %v420_v13 }
 0x194   :  { %857 = vst [vmem:[#allocation5 + $0xc70] sm:$0xff] %v421_v14 }
 0x195   :  { %858 = vst [vmem:[#allocation5 + $0xc78] sm:$0xff] %v422_v15 }
 0x196   :  { %859 = vst [vmem:[#allocation5 + $0xc80] sm:$0xff] %v423_v16 }
 0x197   :  { %860 = vst [vmem:[#allocation5 + $0xc88] sm:$0xff] %v424_v17 }
 0x198   :  { %861 = vst [vmem:[#allocation5 + $0xc90] sm:$0xff] %v425_v18 }
 0x199   :  { %862 = vst [vmem:[#allocation5 + $0xc98] sm:$0xff] %v426_v19 }
 0x19a   :  { %863 = vst [vmem:[#allocation5 + $0xca0] sm:$0xff] %v427_v20 }
 0x19b   :  { %864 = vst [vmem:[#allocation5 + $0xca8] sm:$0xff] %v428_v21 }
 0x19c   :  { %865 = vst [vmem:[#allocation5 + $0xcb0] sm:$0xff] %v429_v22 }
 0x19d   :  { %866 = vst [vmem:[#allocation5 + $0xcb8] sm:$0xff] %v430_v23 }
 0x19e   :  { %867 = vst [vmem:[#allocation5 + $0xcc0] sm:$0xff] %v431_v24 }
 0x19f   :  { %868 = vst [vmem:[#allocation5 + $0xcc8] sm:$0xff] %v432_v25 }
 0x1a0   :  { %869 = vst [vmem:[#allocation5 + $0xcd0] sm:$0xff] %v433_v26 }
 0x1a1   :  { %870 = vst [vmem:[#allocation5 + $0xcd8] sm:$0xff] %v434_v27 }
 0x1a2   :  { %871 = vst [vmem:[#allocation5 + $0xce0] sm:$0xff] %v435_v28 }
 0x1a3   :  { %872 = vst [vmem:[#allocation5 + $0xce8] sm:$0xff] %v436_v29 }
 0x1a4   :  { %873 = vst [vmem:[#allocation5 + $0xcf0] sm:$0xff] %v437_v30 }
 0x1a5   :  { %874 = vst [vmem:[#allocation5 + $0xcf8] sm:$0xff] %v438_v31 }
 0x1a6   :  { %875 = vst [vmem:[#allocation5 + $0xd00] sm:$0xff] %v439_v32 }
 0x1a7   :  { %876 = vst [vmem:[#allocation5 + $0xd08] sm:$0xff] %v440_v33 }
 0x1a8   :  { %877 = vst [vmem:[#allocation5 + $0xd10] sm:$0xff] %v441_v34 }
 0x1a9   :  { %878 = vst [vmem:[#allocation5 + $0xd18] sm:$0xff] %v442_v35 }
 0x1aa   :  { %879 = vst [vmem:[#allocation5 + $0xd20] sm:$0xff] %v443_v36 }
 0x1ab   :  { %880 = vst [vmem:[#allocation5 + $0xd28] sm:$0xff] %v444_v37 }
 0x1ac   :  { %881 = vst [vmem:[#allocation5 + $0xd30] sm:$0xff] %v445_v38 }
 0x1ad   :  { %882 = vst [vmem:[#allocation5 + $0xd38] sm:$0xff] %v446_v39 }
 0x1ae   :  { %883 = vst [vmem:[#allocation5 + $0xd40] sm:$0xff] %v447_v40 }
 0x1af   :  { %884 = vst [vmem:[#allocation5 + $0xd48] sm:$0xff] %v448_v41 }
 0x1b0   :  { %885 = vst [vmem:[#allocation5 + $0xd50] sm:$0xff] %v449_v42 }
 0x1b1   :  { %886 = vst [vmem:[#allocation5 + $0xd58] sm:$0xff] %v450_v43 }
 0x1b2   :  { %887 = vst [vmem:[#allocation5 + $0xd60] sm:$0xff] %v451_v44 }
 0x1b3   :  { %888 = vst [vmem:[#allocation5 + $0xd68] sm:$0xff] %v452_v45 }
 0x1b4   :  { %889 = vst [vmem:[#allocation5 + $0xd70] sm:$0xff] %v453_v46 }
 0x1b5   :  { %890 = vst [vmem:[#allocation5 + $0xd78] sm:$0xff] %v454_v47 }
 0x1b6   :  { %891 = vst [vmem:[#allocation5 + $0xd80] sm:$0xff] %v455_v48 }
 0x1b7   :  { %892 = vst [vmem:[#allocation5 + $0xd88] sm:$0xff] %v456_v49 }
 0x1b8   :  { %893 = vst [vmem:[#allocation5 + $0xd90] sm:$0xff] %v457_v50 }
 0x1b9   :  { %895 = vst.msk [vmem:[#allocation5 + $0xd98] sm:$0x3] %vm894_vm0, %v458_v51 }
 0x1ba   :  { %906 = dma.vmem_to_hbm [thread:$0]  %s902_s11, 55712, %s904_s14, [#allocation4]  }
 0x1bb   :  { %965 = dma.done.wait [#allocation4], 55712  }
 0x1bc   :  { %966 = vsyncadd [#allocation4], 4294911584 }
 0x1bd   :  { %911 = vsyncpa [#allocation3], 1 }
 0x1be   :  { %912 = vsyncpa [#allocation4], 1 }

</bundles_post_ra>
